<compile_context>
chip_gen: v6e
topology: v6e:2x2x1
jax: 0.10.0
libtpu: 0.0.40
codegen_flags: <defaults>
</compile_context>

<pallas_src>
import jax
import jax.numpy as jnp
from jax.experimental import pallas as pl
from jax.experimental.pallas import tpu as pltpu


def prompt_encoder_kernel(pos_ref, neg_ref, w_ref, b_ref, ws_ref, bs_ref,
                          stats_ref, simproj_ref):
    # pos_ref: (Bb, P, S, D)   neg_ref: (Bb, Q, S, D)
    # w_ref:   (D, Dp)  projection weight (pre-transposed torch layout)
    # b_ref:   (1, Dp)  projection bias
    # ws_ref:  (P*Q, Dp) similarity_proj weight (pre-transposed torch layout)
    # bs_ref:  (1, Dp)  similarity_proj bias
    # stats_ref:   (Bb, 4*S, Dp)
    # simproj_ref: (Bb, Dp)
    Bb, P, S, D = pos_ref.shape
    Q = neg_ref.shape[1]
    Dp = w_ref.shape[1]

    # Single load per operand; reused by both the normalize and projection paths.
    pos = pos_ref[...]
    neg = neg_ref[...]
    w = w_ref[...]
    b = b_ref[...]
    ws = ws_ref[...]
    bs = bs_ref[...]

    # --- F.normalize(p=2, dim=-1, eps=1e-12) then mean over the token axis ---
    # x / max(||x||, eps) == x * rsqrt(max(||x||^2, eps^2))  (rsqrt -> EUP slot)
    eps = 1e-12

    def l2norm_mean(x):                                   # (Bb,K,S,D) -> (Bb,K,D)
        ss = jnp.sum(x * x, axis=-1, keepdims=True)
        inv = jax.lax.rsqrt(jnp.maximum(ss, eps * eps))
        return jnp.mean(x * inv, axis=2)

    pos_avg = l2norm_mean(pos)                            # (Bb, P, D)
    neg_avg = l2norm_mean(neg)                            # (Bb, Q, D)

    # --- projection: one fused tall-skinny MXU matmul per prompt set ---
    pos_proj = (jnp.dot(pos.reshape(Bb * P * S, D), w,
                        preferred_element_type=jnp.float32) + b
                ).reshape(Bb, P, S, Dp)
    neg_proj = (jnp.dot(neg.reshape(Bb * Q * S, D), w,
                        preferred_element_type=jnp.float32) + b
                ).reshape(Bb, Q, S, Dp)

    # --- mean / unbiased std over the prompt axis (torch .std default ddof=1) ---
    inv_pm1 = (1.0 / (P - 1)) if P > 1 else float("nan")  # matches torch NaN for P==1
    inv_qm1 = (1.0 / (Q - 1)) if Q > 1 else float("nan")
    pos_mean = jnp.mean(pos_proj, axis=1)                 # (Bb, S, Dp)
    neg_mean = jnp.mean(neg_proj, axis=1)
    pos_std = jnp.sqrt(jnp.sum((pos_proj - pos_mean[:, None]) ** 2, axis=1) * inv_pm1)
    neg_std = jnp.sqrt(jnp.sum((neg_proj - neg_mean[:, None]) ** 2, axis=1) * inv_qm1)

    # One dense slab store per step: (Bb, 4*S, Dp).
    stats_ref[...] = jnp.concatenate([pos_mean, pos_std, neg_mean, neg_std], axis=1)

    # --- similarity 'bpd,bqd->bpq' (flattened row-major) + Linear(P*Q -> Dp) ---
    # Each of the P*Q lane reductions covers the whole B_BLK block at once.
    acc = jnp.broadcast_to(bs, (Bb, Dp))
    for p in range(P):
        for q in range(Q):
            k = p * Q + q
            col = jnp.sum(pos_avg[:, p, :] * neg_avg[:, q, :],
                          axis=-1, keepdims=True)         # (Bb, 1)
            acc = acc + col * ws[k:k + 1, :]
    simproj_ref[...] = acc


def _pick_b_blk(B, P, Q, S, D, Dp, budget_bytes=12 << 20, cap=64):
    """Largest batch block whose (double-buffered) working set fits the VMEM budget."""
    io = (P + Q) * S * D + 4 * S * Dp + Dp            # pipelined inputs + outputs / sample
    interm = (P + Q) * S * (D + Dp)                   # in-kernel temporaries / sample
    per_sample = 4 * (2 * io + interm)                # f32 bytes, x2 double-buffer on io
    b = max(1, min(cap, B, budget_bytes // max(per_sample, 1)))
    if b >= 8:
        b = (b // 8) * 8                              # sublane-aligned output blocks
    return int(b)


def prompt_encoder(pos, neg, w_proj, b_proj, w_sim, b_sim, *, b_blk=None):
    """pos: (B,P,S,D), neg: (B,Q,S,D); w_proj: (Dp,D) torch layout; b_proj: (Dp,);
    w_sim: (Dp, P*Q) torch layout; b_sim: (Dp,).
    Returns stats (B, 4*S, Dp) and similarity_proj (B, Dp)."""
    B, P, S, D = pos.shape
    Q = neg.shape[1]
    Dp = w_proj.shape[0]
    assert P * Q == w_sim.shape[1]

    if b_blk is None:
        b_blk = _pick_b_blk(B, P, Q, S, D, Dp)

    # Pad the batch so the grid divides evenly (zero rows are numerically safe:
    # normalize gives 0, projection gives the bias, std gives 0); slice it back off.
    Bp = ((B + b_blk - 1) // b_blk) * b_blk
    if Bp != B:
        pad = [(0, Bp - B)] + [(0, 0)] * 3
        pos = jnp.pad(pos, pad)
        neg = jnp.pad(neg, pad)

    wT = jnp.asarray(w_proj.T)            # (D, Dp)
    b2 = b_proj.reshape(1, Dp)
    wsT = jnp.asarray(w_sim.T)            # (P*Q, Dp)
    bs2 = b_sim.reshape(1, Dp)

    out_shapes = (
        jax.ShapeDtypeStruct((Bp, 4 * S, Dp), jnp.float32),
        jax.ShapeDtypeStruct((Bp, Dp), jnp.float32),
    )
    grid = (Bp // b_blk,)
    grid_spec = pltpu.PrefetchScalarGridSpec(
        num_scalar_prefetch=0,
        grid=grid,
        in_specs=[
            pl.BlockSpec((b_blk, P, S, D), lambda i: (i, 0, 0, 0)),
            pl.BlockSpec((b_blk, Q, S, D), lambda i: (i, 0, 0, 0)),
            # Weights/biases: constant index_map -> fetched once, revisited.
            pl.BlockSpec((D, Dp), lambda i: (0, 0)),
            pl.BlockSpec((1, Dp), lambda i: (0, 0)),
            pl.BlockSpec((P * Q, Dp), lambda i: (0, 0)),
            pl.BlockSpec((1, Dp), lambda i: (0, 0)),
        ],
        out_specs=[
            pl.BlockSpec((b_blk, 4 * S, Dp), lambda i: (i, 0, 0)),
            pl.BlockSpec((b_blk, Dp), lambda i: (i, 0)),
        ],
    )

    cost = pl.CostEstimate(
        flops=int(Bp * (2 * (P + Q) * S * D * Dp        # projection matmuls
                        + 4 * (P + Q) * S * D           # normalize + token mean
                        + 4 * (P + Q) * S * Dp          # mean/var over prompts
                        + 2 * P * Q * (D + Dp))),       # similarity + 4->Dp linear
        transcendentals=int(Bp * ((P + Q) * S + 2 * S * Dp)),
        bytes_accessed=int(4 * (Bp * (P + Q) * S * D + D * Dp + (P * Q + 2) * Dp
                                + Bp * (4 * S + 1) * Dp)),
    )

    stats, simproj = pl.pallas_call(
        prompt_encoder_kernel,
        out_shape=out_shapes,
        grid_spec=grid_spec,
        compiler_params=pltpu.CompilerParams(
            dimension_semantics=("parallel",)),          # independent batch blocks
        cost_estimate=cost,
    )(pos, neg, wT, b2, wsT, bs2)
    return stats[:B], simproj[:B]


def reference(pos, neg, w_proj, b_proj, w_sim, b_sim):
    """Pure-JAX replica of the PyTorch PromptEncoder forward, for validation."""
    def l2n(x):
        n = jnp.sqrt(jnp.sum(x * x, axis=-1, keepdims=True))
        return x / jnp.maximum(n, 1e-12)
    B = pos.shape[0]
    pos_avg = l2n(pos).mean(axis=2)
    neg_avg = l2n(neg).mean(axis=2)
    sim = jnp.einsum('bpd,bqd->bpq', pos_avg, neg_avg)
    pos_proj = pos @ w_proj.T + b_proj
    neg_proj = neg @ w_proj.T + b_proj
    pos_mean = pos_proj.mean(axis=1)
    pos_std = pos_proj.std(axis=1, ddof=1)
    neg_mean = neg_proj.mean(axis=1)
    neg_std = neg_proj.std(axis=1, ddof=1)
    stats = jnp.concatenate([pos_mean, pos_std, neg_mean, neg_std], axis=1)
    simproj = sim.reshape(B, -1) @ w_sim.T + b_sim
    return stats, simproj


if __name__ == "__main__":
    # Small shapes; P*Q = 4 is required by similarity_proj (Linear(4, d_proj)).
    # B=10 with the auto-chosen B_BLK=8 exercises multi-step grid + batch padding.
    B, P, Q, S = 10, 2, 2, 8
    d_model, d_proj = 32, 32

    key = jax.random.PRNGKey(0)
    k1, k2, k3, k4, k5, k6 = jax.random.split(key, 6)
    pos = jax.random.normal(k1, (B, P, S, d_model), jnp.float32)
    neg = jax.random.normal(k2, (B, Q, S, d_model), jnp.float32)
    w_proj = jax.random.normal(k3, (d_proj, d_model), jnp.float32) * 0.05
    b_proj = jax.random.normal(k4, (d_proj,), jnp.float32) * 0.05
    w_sim = jax.random.normal(k5, (d_proj, P * Q), jnp.float32) * 0.05
    b_sim = jax.random.normal(k6, (d_proj,), jnp.float32) * 0.05

    stats, simproj = prompt_encoder(pos, neg, w_proj, b_proj, w_sim, b_sim)
    jax.block_until_ready((stats, simproj))

    stats_ref, simproj_ref = reference(pos, neg, w_proj, b_proj, w_sim, b_sim)
    assert stats.shape == (B, 4 * S, d_proj) and simproj.shape == (B, d_proj)
    assert jnp.allclose(stats, stats_ref, atol=1e-4, rtol=1e-4)
    assert jnp.allclose(simproj, simproj_ref, atol=1e-4, rtol=1e-4)
    print("KERNEL_OK")
</pallas_src>

<mosaic_0001>
module attributes {stable_mosaic.version = 11 : i64} {
  func.func @prompt_encoder_kernel(%arg0: i32, %arg1: memref<8x2x8x32xf32, #tpu.memory_space<vmem>>, %arg2: memref<8x2x8x32xf32, #tpu.memory_space<vmem>>, %arg3: memref<32x32xf32, #tpu.memory_space<vmem>>, %arg4: memref<1x32xf32, #tpu.memory_space<vmem>>, %arg5: memref<4x32xf32, #tpu.memory_space<vmem>>, %arg6: memref<1x32xf32, #tpu.memory_space<vmem>>, %arg7: memref<8x32x32xf32, #tpu.memory_space<vmem>>, %arg8: memref<8x32xf32, #tpu.memory_space<vmem>>) attributes {dimension_semantics = [#tpu.dimension_semantics<parallel>], iteration_bounds = array<i64: 2>, scalar_prefetch = 0 : i64, scratch_operands = 0 : i64, tpu.core_type = #tpu.core_type<tc>, window_params = [{transform_indices = @transform_0, window_bounds = array<i64: 8, 2, 8, 32>}, {transform_indices = @transform_1, window_bounds = array<i64: 8, 2, 8, 32>}, {pipeline_mode = #tpu.pipeline_mode<synchronous>, transform_indices = @transform_2, window_bounds = array<i64: 32, 32>}, {pipeline_mode = #tpu.pipeline_mode<synchronous>, transform_indices = @transform_3, window_bounds = array<i64: 1, 32>}, {pipeline_mode = #tpu.pipeline_mode<synchronous>, transform_indices = @transform_4, window_bounds = array<i64: 4, 32>}, {pipeline_mode = #tpu.pipeline_mode<synchronous>, transform_indices = @transform_5, window_bounds = array<i64: 1, 32>}, {transform_indices = @transform_6, window_bounds = array<i64: 8, 32, 32>}, {transform_indices = @transform_7, window_bounds = array<i64: 8, 32>}]} {
    %c0 = arith.constant 0 : index
    %c0_0 = arith.constant 0 : index
    %c0_1 = arith.constant 0 : index
    %c0_2 = arith.constant 0 : index
    %0 = vector.load %arg1[%c0, %c0_0, %c0_1, %c0_2] : memref<8x2x8x32xf32, #tpu.memory_space<vmem>>, vector<8x2x8x32xf32>
    %c0_3 = arith.constant 0 : index
    %c0_4 = arith.constant 0 : index
    %c0_5 = arith.constant 0 : index
    %c0_6 = arith.constant 0 : index
    %1 = vector.load %arg2[%c0_3, %c0_4, %c0_5, %c0_6] : memref<8x2x8x32xf32, #tpu.memory_space<vmem>>, vector<8x2x8x32xf32>
    %c0_7 = arith.constant 0 : index
    %c0_8 = arith.constant 0 : index
    %2 = vector.load %arg3[%c0_7, %c0_8] : memref<32x32xf32, #tpu.memory_space<vmem>>, vector<32x32xf32>
    %c0_9 = arith.constant 0 : index
    %c0_10 = arith.constant 0 : index
    %3 = vector.load %arg4[%c0_9, %c0_10] : memref<1x32xf32, #tpu.memory_space<vmem>>, vector<1x32xf32>
    %c0_11 = arith.constant 0 : index
    %c0_12 = arith.constant 0 : index
    %4 = vector.load %arg5[%c0_11, %c0_12] : memref<4x32xf32, #tpu.memory_space<vmem>>, vector<4x32xf32>
    %c0_13 = arith.constant 0 : index
    %c0_14 = arith.constant 0 : index
    %5 = vector.load %arg6[%c0_13, %c0_14] : memref<1x32xf32, #tpu.memory_space<vmem>>, vector<1x32xf32>
    %6 = arith.mulf %0, %0 : vector<8x2x8x32xf32>
    %cst = arith.constant dense<0.000000e+00> : vector<8x2x8xf32>
    %7 = vector.multi_reduction <add>, %6, %cst [3] : vector<8x2x8x32xf32> to vector<8x2x8xf32>
    %8 = vector.shape_cast %7 : vector<8x2x8xf32> to vector<8x2x8x1xf32>
    %cst_15 = arith.constant 1.000000e-24 : f32
    %9 = vector.broadcast %cst_15 : f32 to vector<8x2x8x1xf32>
    %10 = arith.maximumf %8, %9 : vector<8x2x8x1xf32>
    %11 = math.rsqrt %10 : vector<8x2x8x1xf32>
    %12 = vector.broadcast %11 : vector<8x2x8x1xf32> to vector<8x2x8x32xf32>
    %13 = arith.mulf %0, %12 : vector<8x2x8x32xf32>
    %cst_16 = arith.constant dense<0.000000e+00> : vector<8x2x32xf32>
    %14 = vector.multi_reduction <add>, %13, %cst_16 [2] : vector<8x2x8x32xf32> to vector<8x2x32xf32>
    %cst_17 = arith.constant 8.000000e+00 : f32
    %15 = vector.broadcast %cst_17 : f32 to vector<8x2x32xf32>
    %16 = arith.divf %14, %15 : vector<8x2x32xf32>
    %17 = arith.mulf %1, %1 : vector<8x2x8x32xf32>
    %cst_18 = arith.constant dense<0.000000e+00> : vector<8x2x8xf32>
    %18 = vector.multi_reduction <add>, %17, %cst_18 [3] : vector<8x2x8x32xf32> to vector<8x2x8xf32>
    %19 = vector.shape_cast %18 : vector<8x2x8xf32> to vector<8x2x8x1xf32>
    %cst_19 = arith.constant 1.000000e-24 : f32
    %20 = vector.broadcast %cst_19 : f32 to vector<8x2x8x1xf32>
    %21 = arith.maximumf %19, %20 : vector<8x2x8x1xf32>
    %22 = math.rsqrt %21 : vector<8x2x8x1xf32>
    %23 = vector.broadcast %22 : vector<8x2x8x1xf32> to vector<8x2x8x32xf32>
    %24 = arith.mulf %1, %23 : vector<8x2x8x32xf32>
    %cst_20 = arith.constant dense<0.000000e+00> : vector<8x2x32xf32>
    %25 = vector.multi_reduction <add>, %24, %cst_20 [2] : vector<8x2x8x32xf32> to vector<8x2x32xf32>
    %cst_21 = arith.constant 8.000000e+00 : f32
    %26 = vector.broadcast %cst_21 : f32 to vector<8x2x32xf32>
    %27 = arith.divf %25, %26 : vector<8x2x32xf32>
    %28 = vector.shape_cast %0 : vector<8x2x8x32xf32> to vector<128x32xf32>
    %cst_22 = arith.constant dense<0.000000e+00> : vector<128x32xf32>
    %29 = tpu.matmul %28, %2, %cst_22 {dimension_numbers = #tpu.dot_dimension_numbers<[1], [0], [0], [1], [0, 0, 1, 1], [], []>} : vector<128x32xf32>, vector<32x32xf32>, vector<128x32xf32> -> vector<128x32xf32>
    %30 = vector.broadcast %3 : vector<1x32xf32> to vector<128x32xf32>
    %31 = arith.addf %29, %30 : vector<128x32xf32>
    %32 = vector.shape_cast %31 : vector<128x32xf32> to vector<8x2x8x32xf32>
    %33 = vector.shape_cast %1 : vector<8x2x8x32xf32> to vector<128x32xf32>
    %cst_23 = arith.constant dense<0.000000e+00> : vector<128x32xf32>
    %34 = tpu.matmul %33, %2, %cst_23 {dimension_numbers = #tpu.dot_dimension_numbers<[1], [0], [0], [1], [0, 0, 1, 1], [], []>} : vector<128x32xf32>, vector<32x32xf32>, vector<128x32xf32> -> vector<128x32xf32>
    %35 = vector.broadcast %3 : vector<1x32xf32> to vector<128x32xf32>
    %36 = arith.addf %34, %35 : vector<128x32xf32>
    %37 = vector.shape_cast %36 : vector<128x32xf32> to vector<8x2x8x32xf32>
    %cst_24 = arith.constant dense<0.000000e+00> : vector<8x8x32xf32>
    %38 = vector.multi_reduction <add>, %32, %cst_24 [1] : vector<8x2x8x32xf32> to vector<8x8x32xf32>
    %cst_25 = arith.constant 2.000000e+00 : f32
    %39 = vector.broadcast %cst_25 : f32 to vector<8x8x32xf32>
    %40 = arith.divf %38, %39 : vector<8x8x32xf32>
    %cst_26 = arith.constant dense<0.000000e+00> : vector<8x8x32xf32>
    %41 = vector.multi_reduction <add>, %37, %cst_26 [1] : vector<8x2x8x32xf32> to vector<8x8x32xf32>
    %cst_27 = arith.constant 2.000000e+00 : f32
    %42 = vector.broadcast %cst_27 : f32 to vector<8x8x32xf32>
    %43 = arith.divf %41, %42 : vector<8x8x32xf32>
    %44 = vector.shape_cast %40 : vector<8x8x32xf32> to vector<8x1x8x32xf32>
    %45 = vector.broadcast %44 : vector<8x1x8x32xf32> to vector<8x2x8x32xf32>
    %46 = arith.subf %32, %45 : vector<8x2x8x32xf32>
    %47 = arith.mulf %46, %46 : vector<8x2x8x32xf32>
    %cst_28 = arith.constant dense<0.000000e+00> : vector<8x8x32xf32>
    %48 = vector.multi_reduction <add>, %47, %cst_28 [1] : vector<8x2x8x32xf32> to vector<8x8x32xf32>
    %cst_29 = arith.constant 1.000000e+00 : f32
    %49 = vector.broadcast %cst_29 : f32 to vector<8x8x32xf32>
    %50 = arith.mulf %48, %49 : vector<8x8x32xf32>
    %51 = math.sqrt %50 : vector<8x8x32xf32>
    %52 = vector.shape_cast %43 : vector<8x8x32xf32> to vector<8x1x8x32xf32>
    %53 = vector.broadcast %52 : vector<8x1x8x32xf32> to vector<8x2x8x32xf32>
    %54 = arith.subf %37, %53 : vector<8x2x8x32xf32>
    %55 = arith.mulf %54, %54 : vector<8x2x8x32xf32>
    %cst_30 = arith.constant dense<0.000000e+00> : vector<8x8x32xf32>
    %56 = vector.multi_reduction <add>, %55, %cst_30 [1] : vector<8x2x8x32xf32> to vector<8x8x32xf32>
    %cst_31 = arith.constant 1.000000e+00 : f32
    %57 = vector.broadcast %cst_31 : f32 to vector<8x8x32xf32>
    %58 = arith.mulf %56, %57 : vector<8x8x32xf32>
    %59 = math.sqrt %58 : vector<8x8x32xf32>
    %60 = tpu.concatenate %40, %51, %43, %59 in 1 : vector<8x8x32xf32>, vector<8x8x32xf32>, vector<8x8x32xf32>, vector<8x8x32xf32> -> vector<8x32x32xf32>
    %c0_32 = arith.constant 0 : index
    %c0_33 = arith.constant 0 : index
    %c0_34 = arith.constant 0 : index
    %61 = vector.load %arg7[%c0_32, %c0_33, %c0_34] : memref<8x32x32xf32, #tpu.memory_space<vmem>>, vector<8x32x32xf32>
    tpu.vector_store %arg7[%c0_32, %c0_33, %c0_34], %60 {strides = array<i32>} : memref<8x32x32xf32, #tpu.memory_space<vmem>>, vector<8x32x32xf32>,
    %62 = vector.shape_cast %5 : vector<1x32xf32> to vector<1x32xf32>
    %63 = vector.broadcast %62 : vector<1x32xf32> to vector<8x32xf32>
    %64 = vector.extract_strided_slice %16 {offsets = [0, 0, 0], sizes = [8, 1, 32], strides = [1, 1, 1]} : vector<8x2x32xf32> to vector<8x1x32xf32>
    %65 = vector.shape_cast %64 : vector<8x1x32xf32> to vector<8x32xf32>
    %66 = vector.extract_strided_slice %27 {offsets = [0, 0, 0], sizes = [8, 1, 32], strides = [1, 1, 1]} : vector<8x2x32xf32> to vector<8x1x32xf32>
    %67 = vector.shape_cast %66 : vector<8x1x32xf32> to vector<8x32xf32>
    %68 = arith.mulf %65, %67 : vector<8x32xf32>
    %cst_35 = arith.constant dense<0.000000e+00> : vector<8xf32>
    %69 = vector.multi_reduction <add>, %68, %cst_35 [1] : vector<8x32xf32> to vector<8xf32>
    %70 = vector.shape_cast %69 : vector<8xf32> to vector<8x1xf32>
    %71 = vector.extract_strided_slice %4 {offsets = [0, 0], sizes = [1, 32], strides = [1, 1]} : vector<4x32xf32> to vector<1x32xf32>
    %72 = vector.broadcast %70 : vector<8x1xf32> to vector<8x32xf32>
    %73 = vector.broadcast %71 : vector<1x32xf32> to vector<8x32xf32>
    %74 = arith.mulf %72, %73 : vector<8x32xf32>
    %75 = arith.addf %63, %74 : vector<8x32xf32>
    %76 = vector.extract_strided_slice %16 {offsets = [0, 0, 0], sizes = [8, 1, 32], strides = [1, 1, 1]} : vector<8x2x32xf32> to vector<8x1x32xf32>
    %77 = vector.shape_cast %76 : vector<8x1x32xf32> to vector<8x32xf32>
    %78 = vector.extract_strided_slice %27 {offsets = [0, 1, 0], sizes = [8, 1, 32], strides = [1, 1, 1]} : vector<8x2x32xf32> to vector<8x1x32xf32>
    %79 = vector.shape_cast %78 : vector<8x1x32xf32> to vector<8x32xf32>
    %80 = arith.mulf %77, %79 : vector<8x32xf32>
    %cst_36 = arith.constant dense<0.000000e+00> : vector<8xf32>
    %81 = vector.multi_reduction <add>, %80, %cst_36 [1] : vector<8x32xf32> to vector<8xf32>
    %82 = vector.shape_cast %81 : vector<8xf32> to vector<8x1xf32>
    %83 = vector.extract_strided_slice %4 {offsets = [1, 0], sizes = [1, 32], strides = [1, 1]} : vector<4x32xf32> to vector<1x32xf32>
    %84 = vector.broadcast %82 : vector<8x1xf32> to vector<8x32xf32>
    %85 = vector.broadcast %83 : vector<1x32xf32> to vector<8x32xf32>
    %86 = arith.mulf %84, %85 : vector<8x32xf32>
    %87 = arith.addf %75, %86 : vector<8x32xf32>
    %88 = vector.extract_strided_slice %16 {offsets = [0, 1, 0], sizes = [8, 1, 32], strides = [1, 1, 1]} : vector<8x2x32xf32> to vector<8x1x32xf32>
    %89 = vector.shape_cast %88 : vector<8x1x32xf32> to vector<8x32xf32>
    %90 = vector.extract_strided_slice %27 {offsets = [0, 0, 0], sizes = [8, 1, 32], strides = [1, 1, 1]} : vector<8x2x32xf32> to vector<8x1x32xf32>
    %91 = vector.shape_cast %90 : vector<8x1x32xf32> to vector<8x32xf32>
    %92 = arith.mulf %89, %91 : vector<8x32xf32>
    %cst_37 = arith.constant dense<0.000000e+00> : vector<8xf32>
    %93 = vector.multi_reduction <add>, %92, %cst_37 [1] : vector<8x32xf32> to vector<8xf32>
    %94 = vector.shape_cast %93 : vector<8xf32> to vector<8x1xf32>
    %95 = vector.extract_strided_slice %4 {offsets = [2, 0], sizes = [1, 32], strides = [1, 1]} : vector<4x32xf32> to vector<1x32xf32>
    %96 = vector.broadcast %94 : vector<8x1xf32> to vector<8x32xf32>
    %97 = vector.broadcast %95 : vector<1x32xf32> to vector<8x32xf32>
    %98 = arith.mulf %96, %97 : vector<8x32xf32>
    %99 = arith.addf %87, %98 : vector<8x32xf32>
    %100 = vector.extract_strided_slice %16 {offsets = [0, 1, 0], sizes = [8, 1, 32], strides = [1, 1, 1]} : vector<8x2x32xf32> to vector<8x1x32xf32>
    %101 = vector.shape_cast %100 : vector<8x1x32xf32> to vector<8x32xf32>
    %102 = vector.extract_strided_slice %27 {offsets = [0, 1, 0], sizes = [8, 1, 32], strides = [1, 1, 1]} : vector<8x2x32xf32> to vector<8x1x32xf32>
    %103 = vector.shape_cast %102 : vector<8x1x32xf32> to vector<8x32xf32>
    %104 = arith.mulf %101, %103 : vector<8x32xf32>
    %cst_38 = arith.constant dense<0.000000e+00> : vector<8xf32>
    %105 = vector.multi_reduction <add>, %104, %cst_38 [1] : vector<8x32xf32> to vector<8xf32>
    %106 = vector.shape_cast %105 : vector<8xf32> to vector<8x1xf32>
    %107 = vector.extract_strided_slice %4 {offsets = [3, 0], sizes = [1, 32], strides = [1, 1]} : vector<4x32xf32> to vector<1x32xf32>
    %108 = vector.broadcast %106 : vector<8x1xf32> to vector<8x32xf32>
    %109 = vector.broadcast %107 : vector<1x32xf32> to vector<8x32xf32>
    %110 = arith.mulf %108, %109 : vector<8x32xf32>
    %111 = arith.addf %99, %110 : vector<8x32xf32>
    %c0_39 = arith.constant 0 : index
    %c0_40 = arith.constant 0 : index
    %112 = vector.load %arg8[%c0_39, %c0_40] : memref<8x32xf32, #tpu.memory_space<vmem>>, vector<8x32xf32>
    tpu.vector_store %arg8[%c0_39, %c0_40], %111 {strides = array<i32>} : memref<8x32xf32, #tpu.memory_space<vmem>>, vector<8x32xf32>,
    return
  }
  func.func @transform_0(%arg0: i32) -> (i32, i32, i32, i32) {
    %c0_i32 = arith.constant 0 : i32
    %c0_i32_0 = arith.constant 0 : i32
    %c0_i32_1 = arith.constant 0 : i32
    %c0_i32_2 = arith.constant 0 : i32
    return %arg0, %c0_i32, %c0_i32_0, %c0_i32_1 : i32, i32, i32, i32
  }
  func.func @transform_1(%arg0: i32) -> (i32, i32, i32, i32) {
    %c0_i32 = arith.constant 0 : i32
    %c0_i32_0 = arith.constant 0 : i32
    %c0_i32_1 = arith.constant 0 : i32
    %c0_i32_2 = arith.constant 0 : i32
    return %arg0, %c0_i32, %c0_i32_0, %c0_i32_1 : i32, i32, i32, i32
  }
  func.func @transform_2(%arg0: i32) -> (i32, i32) {
    %c0_i32 = arith.constant 0 : i32
    %c0_i32_0 = arith.constant 0 : i32
    %c0_i32_1 = arith.constant 0 : i32
    return %c0_i32, %c0_i32_0 : i32, i32
  }
  func.func @transform_3(%arg0: i32) -> (i32, i32) {
    %c0_i32 = arith.constant 0 : i32
    %c0_i32_0 = arith.constant 0 : i32
    %c0_i32_1 = arith.constant 0 : i32
    return %c0_i32, %c0_i32_0 : i32, i32
  }
  func.func @transform_4(%arg0: i32) -> (i32, i32) {
    %c0_i32 = arith.constant 0 : i32
    %c0_i32_0 = arith.constant 0 : i32
    %c0_i32_1 = arith.constant 0 : i32
    return %c0_i32, %c0_i32_0 : i32, i32
  }
  func.func @transform_5(%arg0: i32) -> (i32, i32) {
    %c0_i32 = arith.constant 0 : i32
    %c0_i32_0 = arith.constant 0 : i32
    %c0_i32_1 = arith.constant 0 : i32
    return %c0_i32, %c0_i32_0 : i32, i32
  }
  func.func @transform_6(%arg0: i32) -> (i32, i32, i32) {
    %c0_i32 = arith.constant 0 : i32
    %c0_i32_0 = arith.constant 0 : i32
    %c0_i32_1 = arith.constant 0 : i32
    return %arg0, %c0_i32, %c0_i32_0 : i32, i32, i32
  }
  func.func @transform_7(%arg0: i32) -> (i32, i32) {
    %c0_i32 = arith.constant 0 : i32
    %c0_i32_0 = arith.constant 0 : i32
    return %arg0, %c0_i32 : i32, i32
  }
}

</mosaic_0001>

<bundles_post_ra>
// kernel: tpu_custom_call.1
= control target key start
LH: loop header
LB: loop body
LE: loop exit
PB: predicated region body
PF: predicated region fallthrough
CT: control target
= control target key end

     0   :  { %s3673_s0 = inlined_call_operand.hbm [shape: f32[16,2,8,32], index: 0, kind: input, shape index: {}]   ;;  %s3674_s1 = inlined_call_operand.hbm [shape: f32[16,2,8,32], index: 1, kind: input, shape index: {}]   ;;  %s3675_s2 = inlined_call_operand.hbm [shape: f32[32,32], index: 2, kind: input, shape index: {}]   ;;  %s3676_s3 = inlined_call_operand.vmem [shape: f32[1,32], index: 3, kind: input, shape index: {}]   ;;  %s3677_s4 = inlined_call_operand.vmem [shape: f32[4,32], index: 4, kind: input, shape index: {}]   ;;  %s3678_s5 = inlined_call_operand.vmem [shape: f32[1,32], index: 5, kind: input, shape index: {}]   ;;  %s3679_s6 = inlined_call_operand.hbm [shape: f32[16,32,32], index: 6, kind: output, shape index: {0}]   ;;  %s3680_s7 = inlined_call_operand.hbm [shape: f32[16,32], index: 7, kind: output, shape index: {1}]  }
   0x1   :  { %3692 = sst [smem:[#allocation20_spill]] %s3673_s0 }
   0x2   :  { %3693 = sst [smem:[#allocation21_spill]] %s3675_s2 }
   0x3   :  { %13 = vsyncpa [#allocation3], 0 }
   0x4   :  { %15 = vsyncpa [#allocation3 + $0x1], 0 }
   0x5   :  { %16 = vsyncpa [#allocation6], 0 }
   0x6   :  { %18 = vsyncpa [#allocation6 + $0x1], 0 }
   0x7   :  { %19 = vsyncpa [#allocation4], 0 }
   0x8   :  { %21 = vsyncpa [#allocation4 + $0x1], 0 }
   0x9   :  { %22 = vsyncpa [#allocation10], 0 }
   0xa   :  { %24 = vsyncpa [#allocation10 + $0x1], 0  ;;  %s2489_s24 = smov 0   ;;  %s2491_s25 = smov 0  }
   0xb   :  { %s2493_s26 = smov 0   ;;  %s2495_s27 = smov 0  }
   0xc LB: > { %3694 = sst [smem:[#allocation16_spill]] %s2434_s26  ;;  %s2510_s28 = sadd.s32 4294967295, %s2438_s27   ;;  %s2438_s27 = sphi %s2495_s27, %s3716_s27   ;;  %s2434_s26 = sphi %s2493_s26, %s3718_s26   ;;  %s2430_s25 = sphi %s2491_s25, %s3720_s25   ;;  %s2426_s24 = sphi %s2489_s24, %s3719_s24  }
   0xd   : > { %s1917_s29 = sadd.s32 4294967294, %s2438_s27   ;;  %p50_p0 = scmp.ne.s32.totalorder %s2430_s25, %s2426_s24 }
   0xe   : > { %p3688_p1 = scmp.eq.s32.totalorder %s2510_s28, 0  ;;  %p190_p3 = scmp.eq.s32.totalorder %s1917_s29, 1 }
   0xf   : > { %p1918_p5 = scmp.ge.s32.totalorder %s2438_s27, 1  ;;  %p223_p7 = scmp.lt.s32.totalorder %s2438_s27, 3 }
  0x10   : > { %p2519_p4 = por %p3688_p1, %p50_p0  ;;  %p2524_p6 = por %p190_p3, %p50_p0 }
  0x11   : > { %p2529_p8 = pnand %p1918_p5, %p223_p7  ;;  %s2440_s10 = smov [#allocation7]  }
  0x12   : > { %s3695_s30 = scalar_select %p2519_p4, 1, 0 }
  0x13   : > { %s3696_s8 = scalar_select %p2524_p6, 1, 0 }
  0x14   : > { %s235_s11 = sshll.u32 %s2440_s10, 4  ;;  %p2099_p9 = pneg %p2529_p8  ;;  %s236_s11 = int_to_ptr.vmem [resolvable:$true] %s235_s11 }
  0x15   : > { %3697 = sst [smem:[#allocation17_spill]] %s3696_s8  ;;  %s2543_s13 = sadd.s32 1, %s2438_s27  }
  0x16   : > { %p2538_p11 = pnand %p2099_p9, %p3688_p1  ;;  %3700 = sst [smem:[#allocation18_spill]] %s2543_s13 }
  0x17   : > { %s37_s14 = sadd.s32 1, %s2434_s26  ;;  %s34_s15 = ssub.s32 %s2438_s27, %s2543_s13 }
  0x18   : > { %p2256_p12 = pneg %p2538_p11  ;;  %s2265_s16 = scalar_lea.vmem %s236_s11, 512 }
  0x19   : > { %p2266_p13 = scmp.ne.s32.totalorder %s236_s11, %s2265_s16  ;;  %p2273_p5 = scmp.lt.s32.totalorder %s236_s11, %s236_s11 }
  0x1a   : > { %p2274_p7 = scmp.lt.s32.totalorder %s2265_s16, %s2265_s16 }
  0x1b   : > { %p2268_p0 = pnand %p2266_p13, %p2256_p12 }
  0x1c   : > { %p2275_p10 = por %p2274_p7, %p2273_p5 }
  0x1d   : > { %p2269_p3 = pneg %p2268_p0 }
  0x1f   : > { %p2276_p2 = pnand %p2275_p10, %p2269_p3 }
  0x21   : > { %2279 = shalt.err (!%p2276_p2)
}
  0x22   : > { %s3681_s17 = smov 128   ;;  %s3683_s18 = smov 8  }
  0x23   : > { %s3701_s2 = sld [smem:[#allocation21_spill]]  ;;  %p35_p2 = scmp.eq.s32.totalorder %s34_s15, 0 }
  0x24   : > { %p44_p9 = scmp.ne.s32.totalorder %s2434_s26, %s2430_s25  ;;  %p45_p10 = scmp.eq.s32.totalorder %s2438_s27, 0 }
  0x25   : > { %p2118_p12 = scmp.lt.s32.totalorder %s2438_s27, 2  ;;  %p3703_p0 = scmp.eq.s32.totalorder %s2510_s28, 1 }
  0x26   : > { %s2563_s21 = scalar_select %p35_p2, %s2434_s26, %s37_s14  }
  0x27   : > { %p46_p13 = por %p45_p10, %p44_p9  ;;  %p2567_p3 = por %p3703_p0, %p44_p9 }
  0x28   : > { %3702 = sst [smem:[#allocation19_spill]] %s2563_s21  ;;  %s258_s23 = sand.u32 1, %s2434_s26  }
  0x29   : > { %2102 = dma.hbm_to_vmem [thread:$0]  (!%p2538_p11), %s3701_s2, 512, %s236_s11, [#allocation6], %s3681_s17, %s3681_s17, %s3683_s18  }
  0x2a   : > { %s3704_s22 = scalar_select %p2567_p3, 1, 0 }
  0x2b   : > { %s1978_s29 = sshll.u32 %s2438_s27, 11  ;;  %s2573_s10 = sshll.u32 %s258_s23, 7 }
  0x2c   : > { %s3705_s0 = sld [smem:[#allocation20_spill]]  ;;  %s262_s14 = scalar_lea.vmem [#allocation2], %s2573_s10 }
  0x2d   : > { %s270_s15 = sshll.u32 %s262_s14, 4  ;;  %p2581_p11 = pnand %p2118_p12, %p46_p13  ;;  %s2585_s15 = int_to_ptr.vmem [resolvable:$true] %s270_s15 }
  0x2e   : > { %s2590_s12 = scalar_lea.hbm %s3674_s1, %s1978_s29  ;;  %s2592_s16 = scalar_lea.sflag [#allocation3], %s258_s23 }
  0x2f   : > { %p2282_p7 = pneg %p2581_p11 }
  0x32   : > { %s2578_s11 = scalar_lea.hbm %s3705_s0, %s1978_s29  ;;  %s2285_s21 = scalar_lea.hbm %s3705_s0, 4096 }
  0x33   : > { %s2280_s18 = scalar_lea.hbm %s2578_s11, 2048  ;;  %p2286_p10 = scmp.lt.s32.totalorder %s2578_s11, %s3705_s0 }
  0x34   : > { %p2281_p5 = scmp.ne.s32.totalorder %s2578_s11, %s2280_s18  ;;  %p2287_p12 = scmp.lt.s32.totalorder %s2285_s21, %s2280_s18 }
  0x36   : > { %p2283_p2 = pnand %p2282_p7, %p2281_p5  ;;  %p2288_p13 = por %p2287_p12, %p2286_p10 }
  0x38   : > { %p2284_p9 = pneg %p2283_p2 }
  0x3a   : > { %p2289_p0 = pnand %p2288_p13, %p2284_p9 }
  0x3c   : > { %2292 = shalt.err (!%p2289_p0)
}
  0x3d   : > { %s2293_s17 = scalar_lea.vmem %s2585_s15, 2048  ;;  %s2443_s2 = smov [#allocation2]  }
  0x3e   : > { %p2294_p1 = scmp.ne.s32.totalorder %s2585_s15, %s2293_s17  ;;  %s2298_s23 = sshll.u32 %s2443_s2, 4  ;;  %s2299_s23 = int_to_ptr.vmem [resolvable:$false] %s2298_s23 }
  0x3f   : > { %s2300_s29 = scalar_lea.vmem %s2299_s23, 4096  ;;  %p2301_p6 = scmp.lt.s32.totalorder %s2585_s15, %s2299_s23 }
  0x40   : > { %p2296_p5 = pnand %p2294_p1, %p2282_p7  ;;  %p2302_p3 = scmp.lt.s32.totalorder %s2300_s29, %s2293_s17 }
  0x42   : > { %p2297_p2 = pneg %p2296_p5  ;;  %p2303_p4 = por %p2302_p3, %p2301_p6 }
  0x44   : > { %p2304_p10 = pnand %p2303_p4, %p2297_p2 }
  0x46   : > { %2307 = shalt.err (!%p2304_p10)
}
  0x47   : > { %s3707_s26 = smov 8   ;;  %s3708_s13 = smov 128  }
  0x48   : > { %2106 = dma.hbm_to_vmem [thread:$0]  (!%p2581_p11), %s2578_s11, 2048, %s2585_s15, %s2592_s16, %s3708_s13, %s3708_s13, %s3707_s26  }
  0x49   : > { %s284_s18 = scalar_lea.vmem [#allocation5], %s2573_s10  ;;  %s280_s20 = sand.u32 1, %s2438_s27  }
  0x4a   : > { %s292_s21 = sshll.u32 %s284_s18, 4  ;;  %s281_s14 = scalar_lea.sflag [#allocation6], %s280_s20  ;;  %s2624_s21 = int_to_ptr.vmem [resolvable:$true] %s292_s21 }
  0x4b   : > { %s2308_s17 = scalar_lea.hbm %s2590_s12, 2048  ;;  %s2313_s29 = scalar_lea.hbm %s3674_s1, 4096 }
  0x4c   : > { %p2309_p1 = scmp.ne.s32.totalorder %s2590_s12, %s2308_s17  ;;  %p2314_p3 = scmp.lt.s32.totalorder %s2590_s12, %s3674_s1 }
  0x4d   : > { %p2315_p9 = scmp.lt.s32.totalorder %s2313_s29, %s2308_s17 }
  0x4e   : > { %p2311_p4 = pnand %p2309_p1, %p2282_p7 }
  0x4f   : > { %p2316_p12 = por %p2315_p9, %p2314_p3 }
  0x50   : > { %p2312_p6 = pneg %p2311_p4 }
  0x52   : > { %p2317_p13 = pnand %p2316_p12, %p2312_p6 }
  0x54   : > { %2320 = shalt.err (!%p2317_p13)
}
  0x55   : > { %s2321_s10 = scalar_lea.vmem %s2624_s21, 2048  ;;  %s2444_s11 = smov [#allocation5]  }
  0x56   : > { %p2322_p0 = scmp.ne.s32.totalorder %s2624_s21, %s2321_s10  ;;  %s2326_s15 = sshll.u32 %s2444_s11, 4  ;;  %s2327_s15 = int_to_ptr.vmem [resolvable:$false] %s2326_s15 }
  0x57   : > { %s2328_s16 = scalar_lea.vmem %s2327_s15, 4096  ;;  %p2329_p10 = scmp.lt.s32.totalorder %s2624_s21, %s2327_s15 }
  0x58   : > { %p2324_p5 = pnand %p2322_p0, %p2282_p7  ;;  %p2330_p1 = scmp.lt.s32.totalorder %s2328_s16, %s2321_s10 }
  0x5a   : > { %p2325_p2 = pneg %p2324_p5  ;;  %p2331_p4 = por %p2330_p1, %p2329_p10 }
  0x5c   : > { %p2332_p3 = pnand %p2331_p4, %p2325_p2 }
  0x5e   : > { %2335 = shalt.err (!%p2332_p3)
}
  0x5f   : > { %2109 = dma.hbm_to_vmem [thread:$0]  (!%p2581_p11), %s2590_s12, 2048, %s2624_s21, %s281_s14, %s3708_s13, %s3708_s13, %s3707_s26  }
  0x60   : > { %304 = sbr.rel (%p2529_p8) target bundleno = 530 (0x212), region = 44  ;;  %s2654_s0 = sand.u32 (!%p2529_p8), 1, %s2430_s25  }
  0x61   : > { %s1930_s8 = sshll.u32 (!%p2529_p8), %s2654_s0, 7  ;;  %s307_s18 = scalar_lea.sflag (!%p2529_p8), [#allocation3], %s2654_s0 }
  0x62   : > { %s2658_s20 = scalar_lea.vmem (!%p2529_p8), [#allocation2], %s1930_s8  ;;  %p3709_p7 = scmp.ne.s32.totalorder (!%p2529_p8), %s3695_s30, 0 }
  0x65   : > { %2405 = dma.done.wait (%p3709_p7), %s307_s18, 2048  }
  0x66   : > { %2407 = vsyncadd (%p3709_p7), %s307_s18, 4294965248  ;;  %s315_s19 = sand.u32 1, %s2510_s28   ;;  %s2665_s12 = scalar_lea.vmem [#allocation5], %s1930_s8 }
  0x67   : > { %s316_s9 = scalar_lea.sflag [#allocation6], %s315_s19 }
  0x68   : > { %2409 = dma.done.wait (%p3709_p7), %s316_s9, 2048  }
  0x69   : > { %2411 = vsyncadd (%p3709_p7), %s316_s9, 4294965248  ;;  %p3710_p8 = scmp.eq.s32.totalorder %s2510_s28, 0 }
  0x6b   : > { %2413 = dma.done.wait (%p3710_p8), [#allocation6], 512   ;;  %p3711_p11 = pmov %p3710_p8 }
  0x6c   : > { %v2676_v0 = vld [vmem:[%s2665_s12] sm:$0xff]  ;;  %vm422_vm0 = vcmask 261120   ;;  %v2682_v2 = vld [vmem:[%s2665_s12 + $0x10] sm:$0xff]  ;;  %v2714_v16 = vld [vmem:[%s2665_s12 + $0x8] sm:$0xff]  ;;  %vm1623_vm1 = vcmask 1041409   ;;  %vm1625_vm2 = vcmask 1042434  }
  0x6d   : > { %2415 = vsyncadd (%p3711_p11), [#allocation6], 4294966784  ;;  %v2679_v1 = vld [vmem:[%s2658_s20] sm:$0xff]  ;;  %v648_v3 = vmul.f32 %v2676_v0, %v2676_v0  ;;  %v650_v5 = vmul.f32 %v2682_v2, %v2682_v2  ;;  %v2691_v6 = vld [vmem:[%s2658_s20 + $0x10] sm:$0xff]  ;;  %2063 = vmatprep.mubr.msk.f32.mxu1 %vm422_vm0, %v2676_v0  ;;  %v649_v20 = vmul.f32 %v2714_v16, %v2714_v16  ;;  %vm1627_vm3 = vcmask 1043459   ;;  %s1933_s13 = sshll.u32 %s2654_s0, 8 }
  0x6e   : > { %v406_v4 = vmul.f32 %v2679_v1, %v2679_v1  ;;  %2031 = vmatprep.mubr.msk.f32.mxu0 %vm422_vm0, %v2679_v1  ;;  %v408_v7 = vmul.f32 %v2691_v6, %v2691_v6  ;;  %v2700_v8 = vld [vmem:[%s2665_s12 + $0x20] sm:$0xff]  ;;  %v2717_v17 = vld [vmem:[%s2658_s20 + $0x30] sm:$0xff]  ;;  %v2729_v23 = vld [vmem:[%s2665_s12 + $0x18] sm:$0xff]  ;;  %vm1629_vm4 = vcmask 1044484   ;;  %vm1631_vm5 = vcmask 1045509   ;;  %s3287_s21 = scalar_lea.vmem [#allocation8], %s1933_s13 }
  0x6f   : > { %v2703_v9 = vld [vmem:[%s2658_s20 + $0x20] sm:$0xff]  ;;  %v664_v10 = vsel %vm422_vm0, %v648_v3, 0.0  ;;  %v670_v12 = vsel %vm422_vm0, %v650_v5, 0.0  ;;  %v652_v14 = vmul.f32 %v2700_v8, %v2700_v8  ;;  %v412_v21 = vmul.f32 %v2717_v17, %v2717_v17  ;;  %v2726_v22 = vld [vmem:[%s2665_s12 + $0x30] sm:$0xff]  ;;  %v402_v24 = vld [vmem:[#allocation7 + $0x18] sm:$0xff]  ;;  %s1982_s14 = sshll.u32 %s2510_s28, 12 }
  0x70   : > { %v423_v11 = vsel %vm422_vm0, %v406_v4, 0.0  ;;  %665 = vadd.xlane.f32.xlu1 %v664_v10  ;;  %v429_v13 = vsel %vm422_vm0, %v408_v7, 0.0  ;;  %v410_v15 = vmul.f32 %v2703_v9, %v2703_v9  ;;  %2023 = vmatprep.subr.mxu0 %v402_v24  ;;  %v401_v25 = vld [vmem:[#allocation7 + $0x10] sm:$0xff]  ;;  %v667_v26 = vsel %vm422_vm0, %v649_v20, 0.0  ;;  %v2738_v30 = vld [vmem:[%s2665_s12 + $0x28] sm:$0xff]  ;;  %v2741_v31 = vld [vmem:[%s2658_s20 + $0x40] sm:$0xff]  ;;  %s3599_s29 = scalar_lea.hbm %s3679_s6, %s1982_s14 }
  0x71   : > { %424 = vadd.xlane.f32.xlu0 %v423_v11  ;;  %v676_v18 = vsel %vm422_vm0, %v652_v14, 0.0  ;;  %2055 = vmatprep.subr.mxu1 %v402_v24  ;;  %v441_v27 = vsel %vm422_vm0, %v412_v21, 0.0  ;;  %v654_v28 = vmul.f32 %v2726_v22, %v2726_v22  ;;  %v651_v29 = vmul.f32 %v2729_v23, %v2729_v23  ;;  %v400_v32 = vld [vmem:[#allocation7 + $0x8] sm:$0xff]  ;;  %v399_v33 = vld [vmem:[#allocation7] sm:$0xff]  ;;  %v2762_v44 = vld [vmem:[%s2658_s20 + $0x50] sm:$0xff]  ;;  %s1767_s17 = sshll.u32 %s3287_s21, 4  ;;  %s3601_s17 = int_to_ptr.vmem [resolvable:$true] %s1767_s17 }
  0x72   : > { %v435_v19 = vsel %vm422_vm0, %v410_v15, 0.0  ;;  %2024 = vmatpush3.msra.mxu0 %v402_v24  ;;  %2056 = vmatpush3.msra.mxu1 %v402_v24  ;;  %v653_v36 = vmul.f32 %v2738_v30, %v2738_v30  ;;  %v414_v37 = vmul.f32 %v2741_v31, %v2741_v31  ;;  %v2750_v38 = vld [vmem:[%s2658_s20 + $0x8] sm:$0xff]  ;;  %v2753_v39 = vld [vmem:[%s2665_s12 + $0x40] sm:$0xff]  ;;  %v2765_v45 = vld [vmem:[%s2658_s20 + $0x18] sm:$0xff]  ;;  %v416_v48 = vmul.f32 %v2762_v44, %v2762_v44  ;;  %s1748_s10 = scalar_lea.sflag [#allocation4], %s2654_s0  ;;  %s2336_s11 = scalar_lea.vmem %s3601_s17, 4096 }
  0x73   : > { %2025 = vmatprep.subr.mxu0 %v401_v25  ;;  %2057 = vmatprep.subr.mxu1 %v401_v25  ;;  %v682_v34 = vsel %vm422_vm0, %v654_v28, 0.0  ;;  %v673_v35 = vsel %vm422_vm0, %v651_v29, 0.0  ;;  %v407_v42 = vmul.f32 %v2750_v38, %v2750_v38  ;;  %v656_v43 = vmul.f32 %v2753_v39, %v2753_v39  ;;  %v2782_v50 = vld [vmem:[%s2665_s12 + $0x50] sm:$0xff]  ;;  %v2785_v51 = vld [vmem:[%s2665_s12 + $0x38] sm:$0xff]  ;;  %v2802_v56 = vld [vmem:[%s2658_s20 + $0x28] sm:$0xff]  ;;  %p2337_p6 = scmp.ne.s32.totalorder %s3601_s17, %s2336_s11  ;;  %p3712_p9 = scmp.ne.s32.totalorder %s3704_s22, 0 }
  0x74   : > { %671 = vadd.xlane.f32.xlu1 %v670_v12  ;;  %2026 = vmatpush3.msra.mxu0 %v401_v25  ;;  %v679_v40 = vsel %vm422_vm0, %v653_v36, 0.0  ;;  %v447_v41 = vsel %vm422_vm0, %v414_v37, 0.0  ;;  %v409_v49 = vmul.f32 %v2765_v45, %v2765_v45  ;;  %v453_v52 = vsel %vm422_vm0, %v416_v48, 0.0  ;;  %v2805_v57 = vld [vmem:[%s2658_s20 + $0x60] sm:$0xff]  ;;  %v2822_v62 = vld [vmem:[%s2658_s20 + $0x38] sm:$0xff]  ;;  %v2828_v3 = vld [vmem:[%s2665_s12 + $0x48] sm:$0xff] }
  0x75   : > { %430 = vadd.xlane.f32.xlu0 %v429_v13  ;;  %2058 = vmatpush3.msra.mxu1 %v401_v25  ;;  %v426_v46 = vsel %vm422_vm0, %v407_v42, 0.0  ;;  %v688_v47 = vsel %vm422_vm0, %v656_v43, 0.0  ;;  %v658_v54 = vmul.f32 %v2782_v50, %v2782_v50  ;;  %v655_v55 = vmul.f32 %v2785_v51, %v2785_v51  ;;  %v2825_v63 = vld [vmem:[%s2665_s12 + $0x60] sm:$0xff]  ;;  %v2845_v11 = vld [vmem:[%s2658_s20 + $0x48] sm:$0xff]  ;;  %v2848_v12 = vld [vmem:[%s2658_s20 + $0x70] sm:$0xff]  ;;  %p2338_p12 = pnand %p2337_p6, %p3712_p9  ;;  %s2445_s15 = smov [#allocation8]  }
  0x76   : > { %2027 = vmatprep.subr.mxu0 %v400_v32  ;;  %2059 = vmatprep.subr.mxu1 %v400_v32  ;;  %v432_v53 = vsel %vm422_vm0, %v409_v49, 0.0  ;;  %v418_v60 = vmul.f32 %v2805_v57, %v2805_v57  ;;  %v411_v61 = vmul.f32 %v2802_v56, %v2802_v56  ;;  %v660_v7 = vmul.f32 %v2825_v63, %v2825_v63  ;;  %v2868_v20 = vld [vmem:[%s2658_s20 + $0x58] sm:$0xff]  ;;  %v2871_v21 = vld [vmem:[%s2665_s12 + $0x70] sm:$0xff]  ;;  %v2888_v28 = vld [vmem:[%s2665_s12 + $0x68] sm:$0xff]  ;;  %s2340_s16 = sshll.u32 %s2445_s15, 4  ;;  %s2341_s16 = int_to_ptr.vmem [resolvable:$false] %s2340_s16 }
  0x77   : > { %2028 = vmatpush3.msra.mxu0 %v400_v32  ;;  %2060 = vmatpush3.msra.mxu1 %v400_v32  ;;  %v694_v58 = vsel %vm422_vm0, %v658_v54, 0.0  ;;  %v685_v59 = vsel %vm422_vm0, %v655_v55, 0.0  ;;  %v657_v10 = vmul.f32 %v2828_v3, %v2828_v3  ;;  %v420_v15 = vmul.f32 %v2848_v12, %v2848_v12  ;;  %v2891_v29 = vld [vmem:[%s2658_s20 + $0x68] sm:$0xff]  ;;  %v2908_v36 = vld [vmem:[%s2665_s12 + $0x78] sm:$0xff]  ;;  %p2339_p13 = pneg %p2338_p12  ;;  %s2342_s8 = scalar_lea.vmem %s2341_s16, 8192 }
  0x78   : > { %677 = vadd.xlane.f32.xlu1 %v676_v18  ;;  %2029 = vmatprep.subr.mxu0 %v399_v33  ;;  %v459_v4 = vsel %vm422_vm0, %v418_v60, 0.0  ;;  %v438_v5 = vsel %vm422_vm0, %v411_v61, 0.0  ;;  %v700_v13 = vsel %vm422_vm0, %v660_v7, 0.0  ;;  %v413_v18 = vmul.f32 %v2822_v62, %v2822_v62  ;;  %v2911_v37 = vld [vmem:[%s2658_s20 + $0x78] sm:$0xff]  ;;  %p2343_p0 = scmp.lt.s32.totalorder %s3601_s17, %s2341_s16  ;;  %p2344_p5 = scmp.lt.s32.totalorder %s2342_s8, %s2336_s11 }
  0x79   : > { %436 = vadd.xlane.f32.xlu0 %v435_v19  ;;  %2061 = vmatprep.subr.mxu1 %v399_v33  ;;  %v691_v14 = vsel %vm422_vm0, %v657_v10, 0.0  ;;  %v2865_v19 = vld [vmem:[%s2665_s12 + $0x58] sm:$0xff]  ;;  %v465_v24 = vsel %vm422_vm0, %v420_v15, 0.0  ;;  %v663_v42 = vmul.f32 %v2908_v36, %v2908_v36  ;;  %v417_v43 = vmul.f32 %v2868_v20, %v2868_v20 }
  0x7a   : > { %2030 = vmatpush3.msra.mxu0 %v399_v33  ;;  %2062 = vmatpush3.msra.mxu1 %v399_v33  ;;  %v444_v25 = vsel %vm422_vm0, %v413_v18, 0.0  ;;  %v421_v48 = vmul.f32 %v2911_v37, %v2911_v37  ;;  %v419_v49 = vmul.f32 %v2891_v29, %v2891_v29  ;;  %vm1633_vm6 = vcmask 1046534   ;;  %p2345_p2 = por %p2344_p5, %p2343_p0 }
  0x7b   : > { %2032 = vmatmul.mubr.msk.f32.vlgmr.msra.gmra.mxu0 %vm422_vm0, %v2750_v38  ;;  %2064 = vmatmul.mubr.msk.f32.vlgmr.msra.gmra.mxu1 %vm422_vm0, %v2714_v16  ;;  %vm1635_vm7 = vcmask 1047559  }
  0x7c   : > { %668 = vadd.xlane.f32.xlu1 %v667_v26  ;;  %2034 = vmatprep.mubr.msk.f32.mxu0 %vm422_vm0, %v2691_v6  ;;  %v662_v26 = vmul.f32 %v2871_v21, %v2871_v21  ;;  %p2346_p10 = pnand %p2345_p2, %p2339_p13 }
  0x7d   : > { %442 = vadd.xlane.f32.xlu0 %v441_v27  ;;  %2066 = vmatprep.mubr.msk.f32.mxu1 %vm422_vm0, %v2682_v2  ;;  %v659_v27 = vmul.f32 %v2865_v19, %v2865_v19 }
  0x7e   : > { %v706_v32 = vsel %vm422_vm0, %v662_v26, 0.0 }
  0x7f   : > { %2035 = vmatmul.mubr.msk.f32.gmra.mxu0 %vm422_vm0, %v2765_v45  ;;  %2067 = vmatmul.mubr.msk.f32.gmra.mxu1 %vm422_vm0, %v2729_v23  ;;  %v697_v33 = vsel %vm422_vm0, %v659_v27, 0.0 }
  0x80   : > { %683 = vadd.xlane.f32.xlu1 %v682_v34  ;;  %2037 = vmatprep.mubr.msk.f32.mxu0 %vm422_vm0, %v2703_v9  ;;  %v661_v34 = vmul.f32 %v2888_v28, %v2888_v28 }
  0x81   : > { %674 = vadd.xlane.f32.xlu0 %v673_v35  ;;  %2069 = vmatprep.mubr.msk.f32.mxu1 %vm422_vm0, %v2700_v8  ;;  %v415_v35 = vmul.f32 %v2845_v11, %v2845_v11 }
  0x83   : > { %2038 = vmatmul.mubr.msk.f32.gmra.mxu0 %vm422_vm0, %v2802_v56  ;;  %2070 = vmatmul.mubr.msk.f32.gmra.mxu1 %vm422_vm0, %v2738_v30 }
  0x84   : > { %680 = vadd.xlane.f32.xlu1 %v679_v40  ;;  %2040 = vmatprep.mubr.msk.f32.mxu0 %vm422_vm0, %v2717_v17  ;;  %v703_v40 = vsel %vm422_vm0, %v661_v34, 0.0 }
  0x85   : > { %448 = vadd.xlane.f32.xlu0 %v447_v41  ;;  %2072 = vmatprep.mubr.msk.f32.mxu1 %vm422_vm0, %v2726_v22  ;;  %v450_v41 = vsel %vm422_vm0, %v415_v35, 0.0 }
  0x87   : > { %2041 = vmatmul.mubr.msk.f32.gmra.mxu0 %vm422_vm0, %v2822_v62  ;;  %2073 = vmatmul.mubr.msk.f32.gmra.mxu1 %vm422_vm0, %v2785_v51 }
  0x88   : > { %427 = vadd.xlane.f32.xlu1 %v426_v46  ;;  %2043 = vmatprep.mubr.msk.f32.mxu0 %vm422_vm0, %v2741_v31  ;;  %v709_v46 = vsel %vm422_vm0, %v663_v42, 0.0 }
  0x89   : > { %689 = vadd.xlane.f32.xlu0 %v688_v47  ;;  %2075 = vmatprep.mubr.msk.f32.mxu1 %vm422_vm0, %v2753_v39  ;;  %v456_v47 = vsel %vm422_vm0, %v417_v43, 0.0 }
  0x8b   : > { %2044 = vmatmul.mubr.msk.f32.gmra.mxu0 %vm422_vm0, %v2845_v11  ;;  %2076 = vmatmul.mubr.msk.f32.gmra.mxu1 %vm422_vm0, %v2828_v3 }
  0x8c   : > { %454 = vadd.xlane.f32.xlu1 %v453_v52  ;;  %2046 = vmatprep.mubr.msk.f32.mxu0 %vm422_vm0, %v2762_v44  ;;  %v468_v52 = vsel %vm422_vm0, %v421_v48, 0.0 }
  0x8d   : > { %433 = vadd.xlane.f32.xlu0 %v432_v53  ;;  %2078 = vmatprep.mubr.msk.f32.mxu1 %vm422_vm0, %v2782_v50  ;;  %v462_v53 = vsel %vm422_vm0, %v419_v49, 0.0 }
  0x8f   : > { %2047 = vmatmul.mubr.msk.f32.gmra.mxu0 %vm422_vm0, %v2868_v20  ;;  %2079 = vmatmul.mubr.msk.f32.gmra.mxu1 %vm422_vm0, %v2865_v19 }
  0x90   : > { %695 = vadd.xlane.f32.xlu1 %v694_v58  ;;  %2049 = vmatprep.mubr.msk.f32.mxu0 %vm422_vm0, %v2805_v57 }
  0x91   : > { %686 = vadd.xlane.f32.xlu0 %v685_v59  ;;  %2081 = vmatprep.mubr.msk.f32.mxu1 %vm422_vm0, %v2825_v63 }
  0x93   : > { %2050 = vmatmul.mubr.msk.f32.gmra.mxu0 %vm422_vm0, %v2891_v29  ;;  %2082 = vmatmul.mubr.msk.f32.gmra.mxu1 %vm422_vm0, %v2888_v28 }
  0x94   : > { %460 = vadd.xlane.f32.xlu1 %v459_v4  ;;  %2052 = vmatprep.mubr.msk.f32.mxu0 %vm422_vm0, %v2848_v12 }
  0x95   : > { %439 = vadd.xlane.f32.xlu0 %v438_v5  ;;  %2084 = vmatprep.mubr.msk.f32.mxu1 %vm422_vm0, %v2871_v21 }
  0x97   : > { %2053 = vmatmul.mubr.msk.f32.gmra.mxu0 %vm422_vm0, %v2911_v37  ;;  %2085 = vmatmul.mubr.msk.f32.gmra.mxu1 %vm422_vm0, %v2908_v36 }
  0x98   : > { %701 = vadd.xlane.f32.xlu1 %v700_v13 }
  0x99   : > { %692 = vadd.xlane.f32.xlu0 %v691_v14 }
  0x9c   : > { %466 = vadd.xlane.f32.xlu1 %v465_v24 }
  0x9d   : > { %445 = vadd.xlane.f32.xlu0 %v444_v25 }
  0xa0   : > { %707 = vadd.xlane.f32.xlu1 %v706_v32 }
  0xa1   : > { %698 = vadd.xlane.f32.xlu0 %v697_v33 }
  0xa4   : > { %704 = vadd.xlane.f32.xlu1 %v703_v40 }
  0xa5   : > { %451 = vadd.xlane.f32.xlu0 %v450_v41 }
  0xa8   : > { %710 = vadd.xlane.f32.xlu1 %v709_v46 }
  0xa9   : > { %457 = vadd.xlane.f32.xlu0 %v456_v47 }
  0xac   : > { %469 = vadd.xlane.f32.xlu1 %v468_v52 }
  0xad   : > { %463 = vadd.xlane.f32.xlu0 %v462_v53 }
  0xf9   : > { %v666_v54 = vpop.xlane.xlu1 %665 }
  0xfa   : > { %v425_v55 = vpop.xlane.xlu0 %424  ;;  %v712_v58 = vmax.f32 %v666_v54, 1e-24 }
  0xfb   : > { %v471_v59 = vmax.f32 %v425_v55, 1e-24 }
  0xfc   : > { %2158 = vrsqrt.f32 %v712_v58 }
  0xfd   : > { %2160 = vrsqrt.f32 %v471_v59  ;;  %v672_v60 = vpop.xlane.xlu1 %671 }
  0xfe   : > { %v431_v61 = vpop.xlane.xlu0 %430  ;;  %v714_v4 = vmax.f32 %v672_v60, 1e-24 }
  0xff   : > { %v473_v5 = vmax.f32 %v431_v61, 1e-24 }
 0x100   : > { %2162 = vrsqrt.f32 %v714_v4 }
 0x101   : > { %2164 = vrsqrt.f32 %v473_v5  ;;  %v678_v7 = vpop.xlane.xlu1 %677 }
 0x102   : > { %v437_v10 = vpop.xlane.xlu0 %436  ;;  %v716_v13 = vmax.f32 %v678_v7, 1e-24 }
 0x103   : > { %v475_v14 = vmax.f32 %v437_v10, 1e-24 }
 0x104   : > { %2166 = vrsqrt.f32 %v716_v13 }
 0x105   : > { %2168 = vrsqrt.f32 %v475_v14  ;;  %v669_v15 = vpop.xlane.xlu1 %668 }
 0x106   : > { %v443_v18 = vpop.xlane.xlu0 %442  ;;  %v713_v24 = vmax.f32 %v669_v15, 1e-24 }
 0x107   : > { %v477_v25 = vmax.f32 %v443_v18, 1e-24 }
 0x108   : > { %2170 = vrsqrt.f32 %v713_v24 }
 0x109   : > { %v2159_v26 = vpop.eup %2158  ;;  %2172 = vrsqrt.f32 %v477_v25  ;;  %v684_v27 = vpop.xlane.xlu1 %683 }
 0x10a   : > { %v675_v32 = vpop.xlane.xlu0 %674  ;;  %v2161_v33 = vpop.eup %2160  ;;  %v744_v34 = vmul.f32 %v2159_v26, %v2676_v0  ;;  %v718_v35 = vmax.f32 %v684_v27, 1e-24 }
 0x10b   : > { %v715_v40 = vmax.f32 %v675_v32, 1e-24  ;;  %v503_v41 = vmul.f32 %v2161_v33, %v2679_v1 }
 0x10c   : > { %v760_v42 = vsel %vm422_vm0, %v744_v34, 0.0  ;;  %2174 = vrsqrt.f32 %v718_v35 }
 0x10d   : > { %v2163_v43 = vpop.eup %2162  ;;  %v761_v46 = vrot.slane %v760_v42, 4  ;;  %v519_v47 = vsel %vm422_vm0, %v503_v41, 0.0  ;;  %2176 = vrsqrt.f32 %v715_v40  ;;  %v681_v48 = vpop.xlane.xlu1 %680 }
 0x10e   : > { %v449_v49 = vpop.xlane.xlu0 %448  ;;  %v2165_v52 = vpop.eup %2164  ;;  %v520_v53 = vrot.slane %v519_v47, 4  ;;  %v746_v54 = vmul.f32 %v2163_v43, %v2682_v2  ;;  %v717_v55 = vmax.f32 %v681_v48, 1e-24 }
 0x10f   : > { %v479_v0 = vmax.f32 %v449_v49, 1e-24  ;;  %v762_v58 = vadd.f32 %v761_v46, %v760_v42  ;;  %v505_v59 = vmul.f32 %v2165_v52, %v2691_v6 }
 0x110   : > { %v521_v1 = vadd.f32 %v520_v53, %v519_v47  ;;  %v774_v60 = vsel %vm422_vm0, %v746_v54, 0.0  ;;  %2178 = vrsqrt.f32 %v717_v55 }
 0x111   : > { %v2167_v61 = vpop.eup %2166  ;;  %v763_v4 = vrot.slane %v762_v58, 2  ;;  %v775_v5 = vrot.slane %v774_v60, 4  ;;  %v533_v7 = vsel %vm422_vm0, %v505_v59, 0.0  ;;  %2180 = vrsqrt.f32 %v479_v0  ;;  %v428_v10 = vpop.xlane.xlu1 %427 }
 0x112   : > { %v690_v13 = vpop.xlane.xlu0 %689  ;;  %v2169_v14 = vpop.eup %2168  ;;  %v522_v15 = vrot.slane %v521_v1, 2  ;;  %v534_v2 = vrot.slane %v533_v7, 4  ;;  %v748_v18 = vmul.f32 %v2167_v61, %v2700_v8  ;;  %v472_v24 = vmax.f32 %v428_v10, 1e-24 }
 0x113   : > { %v2940_v25 = vadd.f32 %v763_v4, %v762_v58  ;;  %v776_v6 = vadd.f32 %v775_v5, %v774_v60  ;;  %v507_v26 = vmul.f32 %v2169_v14, %v2703_v9  ;;  %v720_v27 = vmax.f32 %v690_v13, 1e-24 }
 0x114   : > { %v2943_v32 = vadd.f32 %v522_v15, %v521_v1  ;;  %v535_v33 = vadd.f32 %v534_v2, %v533_v7  ;;  %v788_v34 = vsel %vm422_vm0, %v748_v18, 0.0  ;;  %2182 = vrsqrt.f32 %v472_v24 }
 0x115   : > { %v2171_v35 = vpop.eup %2170  ;;  %v765_v40 = vrot.slane %v2940_v25, 1  ;;  %v777_v41 = vrot.slane %v776_v6, 2  ;;  %v789_v42 = vrot.slane %v788_v34, 4  ;;  %v547_v8 = vsel %vm422_vm0, %v507_v26, 0.0  ;;  %v455_v43 = vpop.xlane.xlu1 %454 }
 0x116   : > { %v434_v46 = vpop.xlane.xlu0 %433  ;;  %v2173_v47 = vpop.eup %2172  ;;  %v524_v48 = vrot.slane %v2943_v32, 1  ;;  %v536_v9 = vrot.slane %v535_v33, 2  ;;  %v548_v49 = vrot.slane %v547_v8, 4  ;;  %v745_v52 = vmul.f32 %v2171_v35, %v2714_v16 }
 0x117   : > { %v2950_v53 = vadd.f32 %v777_v41, %v776_v6  ;;  %v790_v54 = vadd.f32 %v789_v42, %v788_v34  ;;  %v509_v55 = vmul.f32 %v2173_v47, %v2717_v17  ;;  %2184 = vrsqrt.f32 %v720_v27 }
 0x118   : > { %v2953_v0 = vadd.f32 %v536_v9, %v535_v33  ;;  %v549_v58 = vadd.f32 %v548_v49, %v547_v8  ;;  %v767_v59 = vsel %vm422_vm0, %v745_v52, 0.0  ;;  %v481_v1 = vmax.f32 %v455_v43, 1e-24 }
 0x119   : > { %v2175_v60 = vpop.eup %2174  ;;  %v779_v61 = vrot.slane %v2950_v53, 1  ;;  %v791_v4 = vrot.slane %v790_v54, 2  ;;  %v768_v5 = vrot.slane %v767_v59, 4  ;;  %v561_v7 = vsel %vm422_vm0, %v509_v55, 0.0  ;;  %v696_v16 = vpop.xlane.xlu1 %695 }
 0x11a   : > { %v687_v10 = vpop.xlane.xlu0 %686  ;;  %v2177_v13 = vpop.eup %2176  ;;  %v538_v14 = vrot.slane %v2953_v0, 1  ;;  %v550_v17 = vrot.slane %v549_v58, 2  ;;  %v562_v15 = vrot.slane %v561_v7, 4  ;;  %v750_v2 = vmul.f32 %v2175_v60, %v2726_v22 }
 0x11b   : > { %v2960_v18 = vadd.f32 %v791_v4, %v790_v54  ;;  %v769_v24 = vadd.f32 %v768_v5, %v767_v59  ;;  %v747_v6 = vmul.f32 %v2177_v13, %v2729_v23  ;;  %2186 = vrsqrt.f32 %v481_v1 }
 0x11c   : > { %v2963_v26 = vadd.f32 %v550_v17, %v549_v58  ;;  %v2965_v27 = vadd.f32 %v562_v15, %v561_v7  ;;  %v802_v33 = vsel %vm422_vm0, %v750_v2, 0.0  ;;  %v474_v34 = vmax.f32 %v434_v46, 1e-24 }
 0x11d   : > { %v2179_v35 = vpop.eup %2178  ;;  %v770_v41 = vrot.slane %v769_v24, 2  ;;  %v803_v42 = vrot.slane %v802_v33, 4  ;;  %v781_v8 = vsel %vm422_vm0, %v747_v6, 0.0  ;;  %v722_v43 = vmax.f32 %v696_v16, 1e-24  ;;  %v461_v22 = vpop.xlane.xlu1 %460 }
 0x11e   : > { %v440_v47 = vpop.xlane.xlu0 %439  ;;  %v2181_v9 = vpop.eup %2180  ;;  %v564_v49 = vrot.slane %v2965_v27, 2  ;;  %v782_v23 = vrot.slane %v781_v8, 4  ;;  %v749_v52 = vmul.f32 %v2179_v35, %v2738_v30  ;;  %2188 = vrsqrt.f32 %v474_v34 }
 0x11f   : > { %v2971_v54 = vadd.f32 %v770_v41, %v769_v24  ;;  %v2973_v55 = vadd.f32 %v803_v42, %v802_v33  ;;  %v511_v46 = vmul.f32 %v2181_v9, %v2741_v31  ;;  %2190 = vrsqrt.f32 %v722_v43 }
 0x120   : > { %v783_v58 = vadd.f32 %v782_v23, %v781_v8  ;;  %v795_v59 = vsel %vm422_vm0, %v749_v52, 0.0  ;;  %v719_v1 = vmax.f32 %v687_v10, 1e-24  ;;  %v483_v60 = vmax.f32 %v461_v22, 1e-24 }
 0x121   : > { %v2183_v4 = vpop.eup %2182  ;;  %v772_v5 = vrot.slane %v2971_v54, 1  ;;  %v805_v7 = vrot.slane %v2973_v55, 2  ;;  %v796_v16 = vrot.slane %v795_v59, 4  ;;  %v575_v30 = vsel %vm422_vm0, %v511_v46, 0.0  ;;  %v702_v13 = vpop.xlane.xlu1 %701 }
 0x122   : > { %v693_v17 = vpop.xlane.xlu0 %692  ;;  %v784_v15 = vrot.slane %v783_v58, 2  ;;  %v576_v2 = vrot.slane %v575_v30, 4  ;;  %v504_v31 = vmul.f32 %v2183_v4, %v2750_v38  ;;  %2192 = vrsqrt.f32 %v719_v1 }
 0x123   : > { %v797_v24 = vadd.f32 %v796_v16, %v795_v59  ;;  %2194 = vrsqrt.f32 %v483_v60  ;;  %v476_v6 = vmax.f32 %v440_v47, 1e-24  ;;  %v724_v10 = vmax.f32 %v702_v13, 1e-24 }
 0x124   : > { %v2185_v33 = vpop.eup %2184  ;;  %v2981_v34 = vadd.f32 %v784_v15, %v783_v58  ;;  %v577_v35 = vadd.f32 %v576_v2, %v575_v30  ;;  %v526_v41 = vsel %vm422_vm0, %v504_v31, 0.0  ;;  %v721_v42 = vmax.f32 %v693_v17, 1e-24 }
 0x125   : > { %v798_v8 = vrot.slane %v797_v24, 2  ;;  %v527_v43 = vrot.slane %v526_v41, 4  ;;  %v752_v22 = vmul.f32 %v2185_v33, %v2753_v39  ;;  %2196 = vrsqrt.f32 %v476_v6  ;;  %v467_v9 = vpop.xlane.xlu1 %466 }
 0x126   : > { %v446_v23 = vpop.xlane.xlu0 %445  ;;  %v786_v38 = vrot.slane %v2981_v34, 1  ;;  %2198 = vrsqrt.f32 %v724_v10  ;;  %v485_v52 = vmax.f32 %v467_v9, 1e-24  ;;  %v525_v39 = vadd.f32 %v524_v48, %v2943_v32 }
 0x127   : > { %v478_v47 = vmax.f32 %v446_v23, 1e-24  ;;  %v2986_v46 = vadd.f32 %v798_v8, %v797_v24  ;;  %v528_v58 = vadd.f32 %v527_v43, %v526_v41  ;;  %v816_v59 = vsel %vm422_vm0, %v752_v22, 0.0 }
 0x128   : > { %2200 = vrsqrt.f32 %v721_v42  ;;  %v2187_v1 = vpop.eup %2186  ;;  %v817_v60 = vrot.slane %v816_v59, 4  ;;  %v2995_v4 = vadd.f32 %v538_v14, %v2953_v0  ;;  %v552_v15 = vrot.slane %v2963_v26, 1 }
 0x129   : > { %2202 = vrsqrt.f32 %v485_v52  ;;  %v529_v16 = vrot.slane %v528_v58, 2  ;;  %v513_v30 = vmul.f32 %v2187_v1, %v2762_v44  ;;  %v708_v13 = vpop.xlane.xlu1 %707  ;;  %v565_v6 = vadd.f32 %v564_v49, %v2965_v27 }
 0x12a   : > { %2204 = vrsqrt.f32 %v478_v47  ;;  %v699_v17 = vpop.xlane.xlu0 %698  ;;  %v2999_v2 = vadd.f32 %v817_v60, %v816_v59  ;;  %v726_v31 = vmax.f32 %v708_v13, 1e-24  ;;  %v3006_v14 = vadd.f32 %v552_v15, %v2963_v26 }
 0x12b   : > { %v723_v24 = vmax.f32 %v699_v17, 1e-24  ;;  %v2189_v32 = vpop.eup %2188  ;;  %v3002_v48 = vadd.f32 %v529_v16, %v528_v58  ;;  %v589_v0 = vsel %vm422_vm0, %v513_v30, 0.0  ;;  %v578_v44 = vrot.slane %v577_v35, 2 }
 0x12c   : > { %v2191_v10 = vpop.eup %2190  ;;  %v590_v33 = vrot.slane %v589_v0, 4  ;;  %v506_v41 = vmul.f32 %v2189_v32, %v2765_v45  ;;  %2206 = vrsqrt.f32 %v726_v31  ;;  %v566_v42 = vrot.slane %v565_v6, 1 }
 0x12d   : > { %v531_v8 = vrot.slane %v3002_v48, 1  ;;  %v754_v43 = vmul.f32 %v2191_v10, %v2782_v50  ;;  %2208 = vrsqrt.f32 %v723_v24  ;;  %v705_v27 = vpop.xlane.xlu1 %704  ;;  %v579_v22 = vadd.f32 %v578_v44, %v577_v35 }
 0x12e   : > { %v452_v49 = vpop.xlane.xlu0 %451  ;;  %v540_v9 = vsel %vm422_vm0, %v506_v41, 0.0  ;;  %v725_v23 = vmax.f32 %v705_v27, 1e-24  ;;  %v3012_v52 = vadd.f32 %v566_v42, %v565_v6  ;;  %v591_v1 = vadd.f32 %v590_v33, %v589_v0 }
 0x12f   : > { %v480_v26 = vmax.f32 %v452_v49, 1e-24  ;;  %v2193_v47 = vpop.eup %2192  ;;  %v541_v58 = vrot.slane %v540_v9, 4  ;;  %v3015_v45 = vsel %vm422_vm0, %v754_v43, 0.0  ;;  %v580_v59 = vrot.slane %v579_v22, 1 }
 0x130   : > { %v2195_v60 = vpop.eup %2194  ;;  %v831_v50 = vrot.slane %v3015_v45, 4  ;;  %v751_v16 = vmul.f32 %v2193_v47, %v2785_v51  ;;  %2210 = vrsqrt.f32 %v725_v23  ;;  %v3019_v35 = vmul.f32 0.125, %v525_v39 }
 0x131   : > { %v542_v30 = vadd.f32 %v541_v58, %v540_v9  ;;  %v515_v13 = vmul.f32 %v2195_v60, %v2805_v57  ;;  %2212 = vrsqrt.f32 %v480_v26  ;;  %v711_v17 = vpop.xlane.xlu1 %710  ;;  %v3022_v31 = vadd.f32 %v580_v59, %v579_v22 }
 0x132   : > { %v458_v15 = vpop.xlane.xlu0 %457  ;;  %v2197_v24 = vpop.eup %2196  ;;  %v809_v6 = vsel %vm422_vm0, %v751_v16, 0.0  ;;  %v727_v32 = vmax.f32 %v711_v17, 1e-24  ;;  %v592_v44 = vrot.slane %v591_v1, 2 }
 0x133   : > { %v482_v0 = vmax.f32 %v458_v15, 1e-24  ;;  %v2199_v10 = vpop.eup %2198  ;;  %v543_v33 = vrot.slane %v542_v30, 2  ;;  %v810_v51 = vrot.slane %v809_v6, 4  ;;  %v508_v39 = vmul.f32 %v2197_v24, %v2802_v56 }
 0x134   : > { %v603_v41 = vsel %vm422_vm0, %v515_v13, 0.0  ;;  %v3028_v57 = vmul.f32 %v2199_v10, %v2825_v63  ;;  %2214 = vrsqrt.f32 %v727_v32  ;;  %v593_v43 = vadd.f32 %v592_v44, %v591_v1 }
 0x135   : > { %v2201_v42 = vpop.eup %2200  ;;  %v604_v27 = vrot.slane %v603_v41, 4  ;;  %v3030_v22 = vadd.f32 %v543_v33, %v542_v30  ;;  %v3032_v9 = vadd.f32 %v810_v51, %v809_v6  ;;  %v554_v23 = vsel %vm422_vm0, %v508_v39, 0.0  ;;  %v470_v47 = vpop.xlane.xlu1 %469 }
 0x136   : > { %v2203_v49 = vpop.eup %2202  ;;  %v753_v26 = vmul.f32 %v2201_v42, %v2828_v3  ;;  %v464_v56 = vpop.xlane.xlu0 %463  ;;  %v555_v59 = vrot.slane %v554_v23, 4  ;;  %2216 = vrsqrt.f32 %v482_v0  ;;  %v486_v63 = vmax.f32 %v470_v47, 1e-24 }
 0x137   : > { %v2205_v58 = vpop.eup %2204  ;;  %v517_v60 = vmul.f32 %v2203_v49, %v2848_v12  ;;  %v545_v1 = vrot.slane %v3030_v22, 1  ;;  %v812_v16 = vrot.slane %v3032_v9, 2  ;;  %v484_v3 = vmax.f32 %v464_v56, 1e-24 }
 0x138   : > { %v823_v30 = vsel %vm422_vm0, %v753_v26, 0.0  ;;  %v510_v13 = vmul.f32 %v2205_v58, %v2822_v62  ;;  %v556_v17 = vadd.f32 %v555_v59, %v554_v23  ;;  %2218 = vrsqrt.f32 %v486_v63 }
 0x139   : > { %v824_v15 = vrot.slane %v823_v30, 4  ;;  %v2207_v24 = vpop.eup %2206  ;;  %v594_v32 = vrot.slane %v593_v43, 1  ;;  %v605_v44 = vadd.f32 %v604_v27, %v603_v41  ;;  %v617_v12 = vsel %vm422_vm0, %v517_v60, 0.0 }
 0x13a   : > { %v568_v6 = vsel %vm422_vm0, %v510_v13, 0.0  ;;  %v2209_v0 = vpop.eup %2208  ;;  %v557_v10 = vrot.slane %v556_v17, 2  ;;  %v758_v39 = vmul.f32 %v2207_v24, %v2871_v21  ;;  %2220 = vrsqrt.f32 %v484_v3 }
 0x13b   : > { %v3043_v33 = vadd.f32 %v824_v15, %v823_v30  ;;  %v569_v51 = vrot.slane %v568_v6, 4  ;;  %v755_v62 = vmul.f32 %v2209_v0, %v2865_v19  ;;  %v595_v42 = vadd.f32 %v594_v32, %v593_v43 }
 0x13c   : > { %v606_v49 = vrot.slane %v605_v44, 2  ;;  %v3047_v23 = vadd.f32 %v557_v10, %v556_v17  ;;  %v618_v47 = vrot.slane %v617_v12, 4  ;;  %v3052_v41 = vmul.f32 0.125, %v2995_v4 }
 0x13d   : > { %v3049_v26 = vadd.f32 %v569_v51, %v568_v6  ;;  %v2211_v27 = vpop.eup %2210  ;;  %v3055_v56 = vsel %vm422_vm0, %v755_v62, 0.0  ;;  %v3058_v21 = vmul.f32 0.125, %v3006_v14  ;;  %v3061_v19 = vmul.f32 0.125, %v3012_v52 }
 0x13e   : > { %v607_v58 = vadd.f32 %v606_v49, %v605_v44  ;;  %v2213_v43 = vpop.eup %2212  ;;  %v838_v60 = vrot.slane %v3055_v56, 4  ;;  %v3066_v63 = vmul.f32 %v2211_v27, %v2888_v28  ;;  %v619_v4 = vadd.f32 %v618_v47, %v617_v12 }
 0x13f   : > { %v571_v59 = vrot.slane %v3049_v26, 2  ;;  %v512_v30 = vmul.f32 %v2213_v43, %v2845_v11  ;;  %v3070_v17 = vmul.f32 0.125, %v3022_v31  ;;  %v3072_v14 = vmul.f32 0.125, %v595_v42 }
 0x140   : > { %v608_v13 = vrot.slane %v607_v58, 1  ;;  %v620_v15 = vrot.slane %v619_v4, 2  ;;  %v766_v52 = vadd.f32 %v765_v40, %v2940_v25  ;;  %v780_v3 = vadd.f32 %v779_v61, %v2950_v53 }
 0x141   : > { %v793_v28 = vrot.slane %v2960_v18, 1  ;;  %v2215_v24 = vpop.eup %2214  ;;  %v582_v11 = vsel %vm422_vm0, %v512_v30, 0.0  ;;  %v806_v31 = vadd.f32 %v805_v7, %v2973_v55  ;;  %v819_v32 = vrot.slane %v2999_v2, 2 }
 0x142   : > { %v609_v6 = vadd.f32 %v608_v13, %v607_v58  ;;  %v583_v44 = vrot.slane %v582_v11, 4  ;;  %v3087_v12 = vmul.f32 %v2215_v24, %v2908_v36  ;;  %v621_v25 = vadd.f32 %v620_v15, %v619_v4 }
 0x143   : > { %v794_v40 = vadd.f32 %v793_v28, %v2960_v18  ;;  %v2217_v53 = vpop.eup %2216  ;;  %v807_v0 = vrot.slane %v806_v31, 1  ;;  %v820_v10 = vadd.f32 %v819_v32, %v2999_v2  ;;  %v832_v55 = vadd.f32 %v831_v50, %v3015_v45 }
 0x144   : > { %v3090_v61 = vmul.f32 0.125, %v609_v6  ;;  %v3096_v7 = vadd.f32 %v583_v44, %v582_v11  ;;  %v514_v36 = vmul.f32 %v2217_v53, %v2868_v20  ;;  %v622_v51 = vrot.slane %v621_v25, 1 }
 0x145   : > { %v844_v18 = vsel %vm422_vm0, %v3028_v57, 0.0  ;;  %v2219_v62 = vpop.eup %2218  ;;  %v808_v42 = vadd.f32 %v807_v0, %v806_v31  ;;  %v821_v49 = vrot.slane %v820_v10, 1  ;;  %v833_v47 = vrot.slane %v832_v55, 2 }
 0x146   : > { %v845_v27 = vrot.slane %v844_v18, 4  ;;  %v3102_v2 = vsel %vm422_vm0, %v514_v36, 0.0  ;;  %v3105_v45 = vmul.f32 %v2219_v62, %v2911_v37  ;;  %v623_v50 = vadd.f32 %v622_v51, %v621_v25 }
 0x147   : > { %v858_v20 = vsel %vm422_vm0, %v758_v39, 0.0  ;;  %v597_v58 = vrot.slane %v3102_v2, 4  ;;  %v822_v57 = vadd.f32 %v821_v49, %v820_v10  ;;  %v834_v43 = vadd.f32 %v833_v47, %v832_v55  ;;  %v2221_v30 = vpop.eup %2220 }
 0x148   : > { %v846_v4 = vadd.f32 %v845_v27, %v844_v18  ;;  %v3109_v13 = vmul.f32 0.125, %v623_v50  ;;  %v859_v15 = vrot.slane %v858_v20, 4  ;;  %v3111_v28 = vmul.f32 0.125, %v766_v52 }
 0x149   : > { %v3113_v24 = vmul.f32 0.125, %v780_v3  ;;  %v3116_v37 = vmul.f32 %v2221_v30, %v2891_v29  ;;  %v835_v11 = vrot.slane %v834_v43, 1  ;;  %v3118_v39 = vmul.f32 0.125, %v794_v40 }
 0x14a   : > { %v847_v6 = vrot.slane %v846_v4, 2  ;;  %v860_v31 = vadd.f32 %v859_v15, %v858_v20  ;;  %v3120_v32 = vmul.f32 0.125, %v808_v42  ;;  %v3122_v44 = vmul.f32 0.125, %v822_v57 }
 0x14b   : > { %v1607_v25 = vmul.f32 %v3111_v28, %v3019_v35  ;;  %v836_v52 = vadd.f32 %v835_v11, %v834_v43  ;;  %v1608_v3 = vmul.f32 %v3113_v24, %v3052_v41  ;;  %v1609_v29 = vmul.f32 %v3118_v39, %v3058_v21 }
 0x14c   : > { %v848_v53 = vadd.f32 %v847_v6, %v846_v4  ;;  %v861_v0 = vrot.slane %v860_v31, 2  ;;  %v1610_v40 = vmul.f32 %v3120_v32, %v3061_v19  ;;  %v1611_v10 = vmul.f32 %v3122_v44, %v3070_v17 }
 0x14d   : > { %v773_v55 = vadd.f32 %v772_v5, %v2971_v54  ;;  %v3137_v51 = vmul.f32 0.125, %v836_v52  ;;  %v1624_v18 = vsel %vm1623_vm1, %v1608_v3, %v1607_v25  ;;  %v787_v62 = vadd.f32 %v786_v38, %v2981_v34 }
 0x14e   : > { %v849_v36 = vrot.slane %v848_v53, 1  ;;  %v862_v42 = vadd.f32 %v861_v0, %v860_v31  ;;  %v1626_v49 = vsel %vm1625_vm2, %v1609_v29, %v1624_v18  ;;  %v800_v47 = vrot.slane %v2986_v46, 1 }
 0x14f   : > { %v813_v27 = vadd.f32 %v812_v16, %v3032_v9  ;;  %v1612_v5 = vmul.f32 %v3137_v51, %v3072_v14  ;;  %v1628_v50 = vsel %vm1627_vm3, %v1610_v40, %v1626_v49  ;;  %v826_v20 = vrot.slane %v3043_v33, 2 }
 0x150   : > { %v850_v54 = vadd.f32 %v849_v36, %v848_v53  ;;  %v863_v57 = vrot.slane %v862_v42, 1  ;;  %v1630_v34 = vsel %vm1629_vm4, %v1611_v10, %v1628_v50  ;;  %v801_v38 = vadd.f32 %v800_v47, %v2986_v46 }
 0x151   : > { %v814_v43 = vrot.slane %v813_v27, 1  ;;  %v1632_v30 = vsel %vm1631_vm5, %v1612_v5, %v1630_v34  ;;  %v827_v9 = vadd.f32 %v826_v20, %v3043_v33  ;;  %v839_v16 = vadd.f32 %v838_v60, %v3055_v56 }
 0x152   : > { %v3154_v4 = vmul.f32 0.125, %v850_v54  ;;  %v864_v15 = vadd.f32 %v863_v57, %v862_v42  ;;  %v851_v6 = vsel %vm422_vm0, %v3066_v63, 0.0  ;;  %v865_v31 = vsel %vm422_vm0, %v3087_v12, 0.0 }
 0x153   : > { %v815_v11 = vadd.f32 %v814_v43, %v813_v27  ;;  %v828_v25 = vrot.slane %v827_v9, 1  ;;  %v840_v52 = vrot.slane %v839_v16, 2  ;;  %v852_v53 = vrot.slane %v851_v6, 4 }
 0x154   : > { %v1613_v46 = vmul.f32 %v3154_v4, %v3090_v61  ;;  %v3167_v3 = vmul.f32 0.125, %v864_v15  ;;  %v866_v33 = vrot.slane %v865_v31, 4  ;;  %v3169_v29 = vmul.f32 0.125, %v773_v55 }
 0x155   : > { %v3171_v56 = vmul.f32 0.125, %v787_v62  ;;  %v829_v0 = vadd.f32 %v828_v25, %v827_v9  ;;  %v841_v63 = vadd.f32 %v840_v52, %v839_v16  ;;  %v853_v40 = vadd.f32 %v852_v53, %v851_v6 }
 0x156   : > { %v1634_v60 = vsel %vm1633_vm6, %v1613_v46, %v1632_v30  ;;  %v1614_v12 = vmul.f32 %v3167_v3, %v3109_v13  ;;  %v867_v10 = vadd.f32 %v866_v33, %v865_v31  ;;  %v3176_v36 = vmul.f32 0.125, %v801_v38 }
 0x157   : > { %v3178_v18 = vmul.f32 0.125, %v815_v11  ;;  %v842_v42 = vrot.slane %v841_v63, 1  ;;  %v854_v49 = vrot.slane %v853_v40, 2  ;;  %v3180_v47 = vmul.f32 0.125, %v829_v0 }
 0x158   : > { %v1647_v55 = vmul.f32 %v3169_v29, %v3019_v35  ;;  %v1636_v62 = vsel %vm1635_vm7, %v1614_v12, %v1634_v60  ;;  %v868_v27 = vrot.slane %v867_v10, 2  ;;  %v1648_v54 = vmul.f32 %v3171_v56, %v3052_v41 }
 0x159   : > { %v1649_v5 = vmul.f32 %v3176_v36, %v3058_v21  ;;  %v1638_v50 = vsel %vm422_vm0, %v1636_v62, 0.0  ;;  %v843_v20 = vadd.f32 %v842_v42, %v841_v63  ;;  %v855_v57 = vadd.f32 %v854_v49, %v853_v40 }
 0x15a   : > { %v1650_v34 = vmul.f32 %v3178_v18, %v3061_v19  ;;  %1639 = vadd.xlane.f32.xlu0 %v1638_v50  ;;  %v869_v38 = vadd.f32 %v868_v27, %v867_v10  ;;  %v1651_v35 = vmul.f32 %v3180_v47, %v3070_v17  ;;  %v1663_v43 = vsel %vm1623_vm1, %v1648_v54, %v1647_v55  ;;  %v2065_v27 = vpop.f32.mrf.mxu1 }
 0x15b   : > { %v532_v41 = vadd.f32 %v531_v8, %v3002_v48  ;;  %v856_v30 = vrot.slane %v855_v57, 1  ;;  %v3198_v21 = vmul.f32 0.125, %v843_v20  ;;  %v1664_v9 = vsel %vm1625_vm2, %v1649_v5, %v1663_v43 }
 0x15c   : > { %v546_v19 = vadd.f32 %v545_v1, %v3030_v22  ;;  %v870_v16 = vrot.slane %v869_v38, 1  ;;  %v1665_v15 = vsel %vm1627_vm3, %v1650_v34, %v1664_v9  ;;  %v559_v17 = vrot.slane %v3047_v23, 1 }
 0x15d   : > { %v572_v11 = vadd.f32 %v571_v59, %v3049_v26  ;;  %v857_v6 = vadd.f32 %v856_v30, %v855_v57  ;;  %v1652_v48 = vmul.f32 %v3198_v21, %v3072_v14  ;;  %v1666_v8 = vsel %vm1629_vm4, %v1651_v35, %v1665_v15  ;;  %v1201_v15 = vpop.f32.mrf.mxu1 }
 0x15e   : > { %v585_v31 = vrot.slane %v3096_v7, 2  ;;  %v871_v46 = vadd.f32 %v870_v16, %v869_v38  ;;  %v560_v22 = vadd.f32 %v559_v17, %v3047_v23  ;;  %v598_v25 = vadd.f32 %v597_v58, %v3102_v2 }
 0x15f   : > { %v573_v1 = vrot.slane %v572_v11, 1  ;;  %v3217_v52 = vmul.f32 0.125, %v857_v6  ;;  %v1667_v26 = vsel %vm1631_vm5, %v1652_v48, %v1666_v8  ;;  %v610_v14 = vsel %vm422_vm0, %v3116_v37, 0.0  ;;  %v2033_v37 = vpop.f32.mrf.mxu0 }
 0x160   : > { %v586_v59 = vadd.f32 %v585_v31, %v3096_v7  ;;  %v3223_v53 = vmul.f32 0.125, %v871_v46  ;;  %v599_v60 = vrot.slane %v598_v25, 2  ;;  %v611_v0 = vrot.slane %v610_v14, 4  ;;  %v3250_v46 = vld [vmem:[%s3676_s3] ss:$0 sm:$0xff] }
 0x161   : > { %v574_v33 = vadd.f32 %v573_v1, %v572_v11  ;;  %v1653_v23 = vmul.f32 %v3217_v52, %v3090_v61  ;;  %v624_v2 = vsel %vm422_vm0, %v3105_v45, 0.0  ;;  %v633_v58 = vmul.f32 0.125, %v532_v41  ;;  %v1008_v41 = vpop.f32.mrf.mxu0 }
 0x162   : > { %v587_v63 = vrot.slane %v586_v59, 1  ;;  %v1654_v40 = vmul.f32 %v3223_v53, %v3109_v13  ;;  %v600_v7 = vadd.f32 %v599_v60, %v598_v25  ;;  %v612_v12 = vadd.f32 %v611_v0, %v610_v14  ;;  %v2068_v25 = vpop.f32.mrf.mxu1 }
 0x163   : > { %v625_v10 = vrot.slane %v624_v2, 4  ;;  %v1668_v42 = vsel %vm1633_vm6, %v1653_v23, %v1667_v26  ;;  %v635_v55 = vmul.f32 0.125, %v546_v19  ;;  %v637_v62 = vmul.f32 0.125, %v560_v22  ;;  %v2036_v22 = vpop.f32.mrf.mxu0 }
 0x164   : > { %v588_v49 = vadd.f32 %v587_v63, %v586_v59  ;;  %v1669_v61 = vsel %vm1635_vm7, %v1654_v40, %v1668_v42  ;;  %v601_v54 = vrot.slane %v600_v7, 1  ;;  %v613_v5 = vrot.slane %v612_v12, 2 }
 0x165   : > { %v626_v50 = vadd.f32 %v625_v10, %v624_v2  ;;  %v1671_v45 = vsel %vm422_vm0, %v1669_v61, 0.0  ;;  %v639_v20 = vmul.f32 0.125, %v574_v33  ;;  %v1713_v13 = vmul.f32 %v3169_v29, %v633_v58 }
 0x166   : > { %v641_v57 = vmul.f32 0.125, %v588_v49  ;;  %1672 = vadd.xlane.f32.xlu1 %v1671_v45  ;;  %v602_v34 = vadd.f32 %v601_v54, %v600_v7  ;;  %v614_v38 = vadd.f32 %v613_v5, %v612_v12  ;;  %v1714_v43 = vmul.f32 %v3171_v56, %v635_v55 }
 0x167   : > { %v627_v35 = vrot.slane %v626_v50, 2  ;;  %v1715_v30 = vmul.f32 %v3176_v36, %v637_v62  ;;  %v1716_v9 = vmul.f32 %v3178_v18, %v639_v20  ;;  %v1680_v16 = vmul.f32 %v3111_v28, %v633_v58  ;;  %v1018_v58 = vpop.f32.mrf.mxu0 }
 0x168   : > { %v1717_v19 = vmul.f32 %v3180_v47, %v641_v57  ;;  %v615_v17 = vrot.slane %v614_v38, 1  ;;  %v643_v6 = vmul.f32 0.125, %v602_v34  ;;  %v1729_v29 = vsel %vm1623_vm1, %v1714_v43, %v1713_v13 }
 0x169   : > { %v628_v11 = vadd.f32 %v627_v35, %v626_v50  ;;  %v1730_v48 = vsel %vm1625_vm2, %v1715_v30, %v1729_v29  ;;  %v1681_v8 = vmul.f32 %v3113_v24, %v635_v55  ;;  %v1682_v56 = vmul.f32 %v3118_v39, %v637_v62  ;;  %v2039_v45 = vpop.f32.mrf.mxu0 }
 0x16a   : > { %v1683_v36 = vmul.f32 %v3120_v32, %v639_v20  ;;  %v616_v31 = vadd.f32 %v615_v17, %v614_v38  ;;  %v1718_v47 = vmul.f32 %v3198_v21, %v643_v6  ;;  %v1731_v28 = vsel %vm1627_vm3, %v1716_v9, %v1730_v48 }
 0x16b   : > { %v629_v18 = vrot.slane %v628_v11, 1  ;;  %v1732_v1 = vsel %vm1629_vm4, %v1717_v19, %v1731_v28  ;;  %v1684_v24 = vmul.f32 %v3122_v44, %v641_v57  ;;  %v1685_v39 = vmul.f32 %v3137_v51, %v643_v6 }
 0x16c   : > { %v1696_v32 = vsel %vm1623_vm1, %v1681_v8, %v1680_v16  ;;  %v645_v21 = vmul.f32 0.125, %v616_v31  ;;  %v1733_v59 = vsel %vm1631_vm5, %v1718_v47, %v1732_v1  ;;  %v1014_v60 = vadd.f32 %v2033_v37, %v3250_v46  ;;  %v1211_v37 = vpop.f32.mrf.mxu1 }
 0x16d   : > { %v630_v26 = vadd.f32 %v629_v18, %v628_v11  ;;  %v1697_v14 = vsel %vm1625_vm2, %v1682_v56, %v1696_v32  ;;  %v1207_v0 = vadd.f32 %v2065_v27, %v3250_v46  ;;  %v1009_v44 = vadd.f32 %v3250_v46, %v1008_v41  ;;  %v1028_v11 = vpop.f32.mrf.mxu0 }
 0x16e   : > { %v1698_v33 = vsel %vm1627_vm3, %v1683_v36, %v1697_v14  ;;  %v1719_v51 = vmul.f32 %v3217_v52, %v645_v21  ;;  %v1686_v63 = vmul.f32 %v3154_v4, %v645_v21  ;;  %v1281_v7 = vsel %vm422_vm0, %v1014_v60, 0.0  ;;  %v2071_v16 = vpop.f32.mrf.mxu1 }
 0x16f   : > { %v647_v23 = vmul.f32 0.125, %v630_v26  ;;  %v1699_v2 = vsel %vm1629_vm4, %v1684_v24, %v1698_v33  ;;  %v1314_v12 = vsel %vm422_vm0, %v1207_v0, 0.0  ;;  %v1280_v10 = vsel %vm422_vm0, %v1009_v44, 0.0  ;;  %v2042_v26 = vpop.f32.mrf.mxu0 }
 0x170   : > { %v1700_v40 = vsel %vm1631_vm5, %v1685_v39, %v1699_v2  ;;  %v1734_v49 = vsel %vm1633_vm6, %v1719_v51, %v1733_v59  ;;  %v1282_v55 = vadd.f32 %v1281_v7, %v1280_v10  ;;  %v1202_v62 = vadd.f32 %v3250_v46, %v1201_v15  ;;  %v1221_v1 = vpop.f32.mrf.mxu1 }
 0x171   : > { %v1720_v42 = vmul.f32 %v3223_v53, %v647_v23  ;;  %v1687_v52 = vmul.f32 %v3167_v3, %v647_v23  ;;  %v1701_v4 = vsel %vm1633_vm6, %v1686_v63, %v1700_v40  ;;  %v1024_v27 = vadd.f32 %v2036_v22, %v3250_v46 }
 0x172   : > { %v1217_v61 = vadd.f32 %v2068_v25, %v3250_v46  ;;  %v1019_v50 = vadd.f32 %v3250_v46, %v1018_v58  ;;  %v1212_v53 = vadd.f32 %v3250_v46, %v1211_v37  ;;  %v1305_v57 = vmul.f32 0.5, %v1282_v55  ;;  %v2074_v63 = vpop.f32.mrf.mxu1 }
 0x173   : > { %v1735_v54 = vsel %vm1635_vm7, %v1720_v42, %v1734_v49  ;;  %v1702_v5 = vsel %vm1635_vm7, %v1687_v52, %v1701_v4  ;;  %v1313_v13 = vsel %vm422_vm0, %v1202_v62, 0.0  ;;  %v1284_v38 = vsel %vm422_vm0, %v1024_v27, 0.0 }
 0x174   : > { %v1737_v3 = vsel %vm422_vm0, %v1735_v54, 0.0  ;;  %v1704_v20 = vsel %vm422_vm0, %v1702_v5, 0.0  ;;  %v1315_v34 = vadd.f32 %v1314_v12, %v1313_v13  ;;  %v1317_v35 = vsel %vm422_vm0, %v1217_v61, 0.0  ;;  %1569 = vst.msk [vmem:[%s3287_s21] sm:$0xff] %vm422_vm0, %v1305_v57  ;;  %v1038_v12 = vpop.f32.mrf.mxu0  ;;  %v1231_v55 = vpop.f32.mrf.mxu1 }
 0x175   : > { %1738 = vadd.xlane.f32.xlu1 %v1737_v3  ;;  %1705 = vadd.xlane.f32.xlu0 %v1704_v20  ;;  %v1283_v43 = vsel %vm422_vm0, %v1019_v50, 0.0  ;;  %v1345_v41 = vsub.f32 %v1009_v44, %v1305_v57  ;;  %v1346_v30 = vsub.f32 %v1014_v60, %v1305_v57  ;;  %v1316_v19 = vsel %vm422_vm0, %v1212_v53, 0.0 }
 0x176   : > { %v1285_v9 = vadd.f32 %v1284_v38, %v1283_v43  ;;  %v1337_v15 = vmul.f32 0.5, %v1315_v34  ;;  %v1318_v17 = vadd.f32 %v1317_v35, %v1316_v19  ;;  %v1034_v31 = vadd.f32 %v2039_v45, %v3250_v46  ;;  %v2045_v5 = vpop.f32.mrf.mxu0 }
 0x177   : > { %v1361_v6 = vmul.f32 %v1345_v41, %v1345_v41  ;;  %v1362_v29 = vmul.f32 %v1346_v30, %v1346_v30  ;;  %v1029_v33 = vadd.f32 %v3250_v46, %v1028_v11  ;;  %v1227_v60 = vadd.f32 %v2071_v16, %v3250_v46 }
 0x178   : > { %v1306_v48 = vmul.f32 0.5, %v1285_v9  ;;  %v1457_v8 = vsub.f32 %v1202_v62, %v1337_v15  ;;  %v1458_v56 = vsub.f32 %v1207_v0, %v1337_v15  ;;  %1571 = vst.msk [vmem:[%s3287_s21 + $0x10] sm:$0xff] %vm422_vm0, %v1337_v15  ;;  %v1338_v36 = vmul.f32 0.5, %v1318_v17  ;;  %v1048_v9 = vpop.f32.mrf.mxu0 }
 0x179   : > { %v1377_v18 = vsel %vm422_vm0, %v1361_v6, 0.0  ;;  %v1378_v47 = vsel %vm422_vm0, %v1362_v29, 0.0  ;;  %v1287_v10 = vsel %vm422_vm0, %v1034_v31, 0.0  ;;  %v1286_v37 = vsel %vm422_vm0, %v1029_v33, 0.0 }
 0x17a   : > { %v1347_v28 = vsub.f32 %v1019_v50, %v1306_v48  ;;  %v1348_v22 = vsub.f32 %v1024_v27, %v1306_v48  ;;  %1573 = vst.msk [vmem:[%s3287_s21 + $0x20] sm:$0xff] %vm422_vm0, %v1306_v48  ;;  %v3299_v24 = vadd.f32 %v1378_v47, %v1377_v18  ;;  %v1473_v39 = vmul.f32 %v1457_v8, %v1457_v8 }
 0x17b   : > { %v1474_v32 = vmul.f32 %v1458_v56, %v1458_v56  ;;  %v1459_v25 = vsub.f32 %v1212_v53, %v1338_v36  ;;  %1575 = vst.msk [vmem:[%s3287_s21 + $0x30] sm:$0xff] %vm422_vm0, %v1338_v36  ;;  %v1460_v14 = vsub.f32 %v1217_v61, %v1338_v36  ;;  %v1222_v42 = vadd.f32 %v3250_v46, %v1221_v1 }
 0x17c   : > { %v1363_v21 = vmul.f32 %v1347_v28, %v1347_v28  ;;  %v1364_v59 = vmul.f32 %v1348_v22, %v1348_v22  ;;  %2222 = vrsqrt.f32 %v3299_v24  ;;  %v1489_v0 = vsel %vm422_vm0, %v1473_v39, 0.0 }
 0x17d   : > { %v1490_v44 = vsel %vm422_vm0, %v1474_v32, 0.0  ;;  %v1475_v40 = vmul.f32 %v1459_v25, %v1459_v25  ;;  %v1476_v7 = vmul.f32 %v1460_v14, %v1460_v14  ;;  %v1320_v49 = vsel %vm422_vm0, %v1227_v60, 0.0  ;;  %v2077_v14 = vpop.f32.mrf.mxu1 }
 0x17e   : > { %v1380_v23 = vsel %vm422_vm0, %v1363_v21, 0.0  ;;  %v1381_v51 = vsel %vm422_vm0, %v1364_v59, 0.0  ;;  %v3310_v2 = vadd.f32 %v1490_v44, %v1489_v0  ;;  %v1044_v52 = vadd.f32 %v2042_v26, %v3250_v46 }
 0x17f   : > { %v3312_v58 = vadd.f32 %v1381_v51, %v1380_v23  ;;  %vm1403_vm8 = vcmp.eq.f32.partialorder %v3299_v24, inf  ;;  %v3323_v4 = vadd.f32 %v2074_v63, %v3250_v46  ;;  %v1492_v62 = vsel %vm422_vm0, %v1475_v40, 0.0 }
 0x180   : > { %2224 = vrsqrt.f32 %v3310_v2  ;;  %v1493_v27 = vsel %vm422_vm0, %v1476_v7, 0.0  ;;  %v1288_v61 = vadd.f32 %v1287_v10, %v1286_v37  ;;  %v1319_v54 = vsel %vm422_vm0, %v1222_v42, 0.0 }
 0x181   : > { %2226 = vrsqrt.f32 %v3312_v58  ;;  %vm1405_vm9 = vcmp.eq.f32.partialorder %v3299_v24, 0.0  ;;  %v1406_v50 = vand.u32 2147483648, %v3299_v24  ;;  %v3330_v53 = vadd.f32 %v1493_v27, %v1492_v62  ;;  %v1241_v62 = vpop.f32.mrf.mxu1 }
 0x182   : > { %v1321_v45 = vadd.f32 %v1320_v49, %v1319_v54  ;;  %v1307_v3 = vmul.f32 0.5, %v1288_v61  ;;  %v1290_v20 = vsel %vm422_vm0, %v1044_v52, 0.0  ;;  %v1039_v57 = vadd.f32 %v3250_v46, %v1038_v12  ;;  %v2048_v54 = vpop.f32.mrf.mxu0 }
 0x183   : > { %v1232_v13 = vadd.f32 %v3250_v46, %v1231_v55  ;;  %vm1515_vm10 = vcmp.eq.f32.partialorder %v3310_v2, inf  ;;  %v1518_v34 = vand.u32 2147483648, %v3310_v2  ;;  %2228 = vrsqrt.f32 %v3330_v53 }
 0x184   : > { %v1323_v38 = vsel %vm422_vm0, %v3323_v4, 0.0  ;;  %vm1517_vm11 = vcmp.eq.f32.partialorder %v3310_v2, 0.0  ;;  %v1349_v35 = vsub.f32 %v1029_v33, %v1307_v3  ;;  %v1350_v43 = vsub.f32 %v1034_v31, %v1307_v3  ;;  %1577 = vst.msk [vmem:[%s3287_s21 + $0x40] sm:$0xff] %vm422_vm0, %v1307_v3 }
 0x185   : > { %v1339_v41 = vmul.f32 0.5, %v1321_v45  ;;  %v1289_v30 = vsel %vm422_vm0, %v1039_v57, 0.0  ;;  %vm1410_vm12 = vcmp.eq.f32.partialorder %v3312_v58, inf  ;;  %vm1412_vm13 = vcmp.eq.f32.partialorder %v3312_v58, 0.0 }
 0x186   : > { %v1291_v19 = vadd.f32 %v1290_v20, %v1289_v30  ;;  %v1322_v16 = vsel %vm422_vm0, %v1232_v13, 0.0  ;;  %v1365_v15 = vmul.f32 %v1349_v35, %v1349_v35  ;;  %v1366_v17 = vmul.f32 %v1350_v43, %v1350_v43  ;;  %v2080_v35 = vpop.f32.mrf.mxu1 }
 0x187   : > { %v1461_v11 = vsub.f32 %v1222_v42, %v1339_v41  ;;  %v1462_v6 = vsub.f32 %v1227_v60, %v1339_v41  ;;  %1579 = vst.msk [vmem:[%s3287_s21 + $0x50] sm:$0xff] %vm422_vm0, %v1339_v41  ;;  %v1324_v8 = vadd.f32 %v1323_v38, %v1322_v16  ;;  %v3350_v56 = vadd.f32 %v2045_v5, %v3250_v46  ;;  %v1058_v41 = vpop.f32.mrf.mxu0 }
 0x188   : > { %v1308_v48 = vmul.f32 0.5, %v1291_v19  ;;  %v3353_v36 = vadd.f32 %v3250_v46, %v1048_v9  ;;  %v1383_v18 = vsel %vm422_vm0, %v1365_v15, 0.0  ;;  %v1384_v47 = vsel %vm422_vm0, %v1366_v17, 0.0 }
 0x189   : > { %v2223_v29 = vpop.eup %2222  ;;  %v1477_v28 = vmul.f32 %v1461_v11, %v1461_v11  ;;  %v3358_v22 = vadd.f32 %v1384_v47, %v1383_v18  ;;  %v1478_v1 = vmul.f32 %v1462_v6, %v1462_v6  ;;  %v1413_v26 = vand.u32 2147483648, %v3312_v58 }
 0x18a   : > { %v1402_v31 = vmul.f32 %v2223_v29, %v3299_v24  ;;  %v1351_v39 = vsub.f32 %v1039_v57, %v1308_v48  ;;  %v1352_v32 = vsub.f32 %v1044_v52, %v1308_v48  ;;  %1581 = vst.msk [vmem:[%s3287_s21 + $0x60] sm:$0xff] %vm422_vm0, %v1308_v48  ;;  %v1340_v59 = vmul.f32 0.5, %v1324_v8 }
 0x18b   : > { %v1495_v21 = vsel %vm422_vm0, %v1477_v28, 0.0  ;;  %2230 = vrsqrt.f32 %v3358_v22  ;;  %v1293_v0 = vsel %vm422_vm0, %v3350_v56, 0.0  ;;  %v1292_v44 = vsel %vm422_vm0, %v3353_v36, 0.0 }
 0x18c   : > { %v1404_v25 = vsel %vm1403_vm8, %v3299_v24, %v1402_v31  ;;  %v1496_v63 = vsel %vm422_vm0, %v1478_v1, 0.0  ;;  %v1367_v40 = vmul.f32 %v1351_v39, %v1351_v39  ;;  %1583 = vst.msk [vmem:[%s3287_s21 + $0x70] sm:$0xff] %vm422_vm0, %v1340_v59  ;;  %v3381_v24 = vadd.f32 %v2077_v14, %v3250_v46  ;;  %v1251_v31 = vpop.f32.mrf.mxu1 }
 0x18d   : > { %v2225_v33 = vpop.eup %2224  ;;  %v1407_v60 = vsel %vm1405_vm9, %v1406_v50, %v1404_v25  ;;  %v3384_v12 = vadd.f32 %v1496_v63, %v1495_v21  ;;  %v1368_v10 = vmul.f32 %v1352_v32, %v1352_v32  ;;  %v1463_v37 = vsub.f32 %v1232_v13, %v1340_v59 }
 0x18e   : > { %v2227_v23 = vpop.eup %2226  ;;  %1570 = vst.msk [vmem:[%s3287_s21 + $0x8] sm:$0xff] %vm422_vm0, %v1407_v60  ;;  %v1514_v51 = vmul.f32 %v2225_v33, %v3310_v2  ;;  %v1386_v49 = vsel %vm422_vm0, %v1367_v40, 0.0  ;;  %v1464_v52 = vsub.f32 %v3323_v4, %v1340_v59  ;;  %v1294_v55 = vadd.f32 %v1293_v0, %v1292_v44  ;;  %v2083_v63 = vpop.f32.mrf.mxu1 }
 0x18f   : > { %v1409_v7 = vmul.f32 %v2227_v23, %v3312_v58  ;;  %vm1522_vm14 = vcmp.eq.f32.partialorder %v3330_v53, inf  ;;  %2232 = vrsqrt.f32 %v3384_v12  ;;  %vm1524_vm15 = vcmp.eq.f32.partialorder %v3330_v53, 0.0 }
 0x190   : > { %v1516_v42 = vsel %vm1515_vm10, %v3310_v2, %v1514_v51  ;;  %v2229_v5 = vpop.eup %2228  ;;  %v1525_v2 = vand.u32 2147483648, %v3330_v53  ;;  %v1387_v50 = vsel %vm422_vm0, %v1368_v10, 0.0  ;;  %v1479_v20 = vmul.f32 %v1463_v37, %v1463_v37  ;;  %v2051_v51 = vpop.f32.mrf.mxu0 }
 0x191   : > { %v1519_v27 = vsel %vm1517_vm11, %v1518_v34, %v1516_v42  ;;  %v1411_v61 = vsel %vm1410_vm12, %v3312_v58, %v1409_v7  ;;  %v1521_v45 = vmul.f32 %v2229_v5, %v3330_v53  ;;  %v3408_v3 = vadd.f32 %v1387_v50, %v1386_v49 }
 0x192   : > { %1572 = vst.msk [vmem:[%s3287_s21 + $0x18] sm:$0xff] %vm422_vm0, %v1519_v27  ;;  %v1414_v4 = vsel %vm1412_vm13, %v1413_v26, %v1411_v61  ;;  %v1480_v57 = vmul.f32 %v1464_v52, %v1464_v52  ;;  %v1326_v58 = vsel %vm422_vm0, %v3381_v24, 0.0  ;;  %v1309_v13 = vmul.f32 0.5, %v1294_v55  ;;  %v1068_v5 = vpop.f32.mrf.mxu0 }
 0x193   : > { %1574 = vst.msk [vmem:[%s3287_s21 + $0x28] sm:$0xff] %vm422_vm0, %v1414_v4  ;;  %v1242_v34 = vadd.f32 %v3250_v46, %v1241_v62  ;;  %v3414_v38 = vadd.f32 %v2048_v54, %v3250_v46  ;;  %v1523_v43 = vsel %vm1522_vm14, %v3330_v53, %v1521_v45  ;;  %vm1417_vm1 = vcmp.eq.f32.partialorder %v3358_v22, inf  ;;  %v1261_v4 = vpop.f32.mrf.mxu1 }
 0x194   : > { %vm1419_vm2 = vcmp.eq.f32.partialorder %v3358_v22, 0.0  ;;  %2234 = vrsqrt.f32 %v3408_v3  ;;  %v1526_v30 = vsel %vm1524_vm15, %v1525_v2, %v1523_v43  ;;  %v1498_v9 = vsel %vm422_vm0, %v1479_v20, 0.0  ;;  %1585 = vst.msk [vmem:[%s3287_s21 + $0x80] sm:$0xff] %vm422_vm0, %v1309_v13 }
 0x195   : > { %v1499_v19 = vsel %vm422_vm0, %v1480_v57, 0.0  ;;  %v3429_v16 = vadd.f32 %v2080_v35, %v3250_v46  ;;  %1576 = vst.msk [vmem:[%s3287_s21 + $0x38] sm:$0xff] %vm422_vm0, %v1526_v30  ;;  %v1353_v17 = vsub.f32 %v3353_v36, %v1309_v13  ;;  %v1354_v11 = vsub.f32 %v3350_v56, %v1309_v13 }
 0x196   : > { %v3433_v15 = vadd.f32 %v1499_v19, %v1498_v9  ;;  %v1325_v53 = vsel %vm422_vm0, %v1242_v34, 0.0  ;;  %v1420_v6 = vand.u32 2147483648, %v3358_v22  ;;  %v1296_v48 = vsel %vm422_vm0, %v3414_v38, 0.0  ;;  %v2054_v9 = vpop.f32.mrf.mxu0  ;;  %v2086_v19 = vpop.f32.mrf.mxu1 }
 0x197   : > { %v1327_v29 = vadd.f32 %v1326_v58, %v1325_v53  ;;  %v1059_v8 = vadd.f32 %v3250_v46, %v1058_v41  ;;  %vm1529_vm3 = vcmp.eq.f32.partialorder %v3384_v12, inf  ;;  %vm1531_vm4 = vcmp.eq.f32.partialorder %v3384_v12, 0.0 }
 0x198   : > { %v1532_v36 = vand.u32 2147483648, %v3384_v12  ;;  %2236 = vrsqrt.f32 %v3433_v15  ;;  %v2231_v56 = vpop.eup %2230  ;;  %v1369_v18 = vmul.f32 %v1353_v17, %v1353_v17  ;;  %v1370_v47 = vmul.f32 %v1354_v11, %v1354_v11 }
 0x199   : > { %v1341_v28 = vmul.f32 0.5, %v1327_v29  ;;  %v1295_v1 = vsel %vm422_vm0, %v1059_v8, 0.0  ;;  %v1416_v39 = vmul.f32 %v2231_v56, %v3358_v22  ;;  %v1329_v32 = vsel %vm422_vm0, %v3429_v16, 0.0 }
 0x19a   : > { %v1297_v25 = vadd.f32 %v1296_v48, %v1295_v1  ;;  %v1252_v26 = vadd.f32 %v3250_v46, %v1251_v31  ;;  %v1389_v21 = vsel %vm422_vm0, %v1369_v18, 0.0  ;;  %v1390_v59 = vsel %vm422_vm0, %v1370_v47, 0.0  ;;  %v1078_v1 = vpop.f32.mrf.mxu0 }
 0x19b   : > { %v1465_v14 = vsub.f32 %v1242_v34, %v1341_v28  ;;  %v1466_v33 = vsub.f32 %v3381_v24, %v1341_v28  ;;  %1587 = vst.msk [vmem:[%s3287_s21 + $0x90] sm:$0xff] %vm422_vm0, %v1341_v28  ;;  %v1418_v60 = vsel %vm1417_vm1, %v3358_v22, %v1416_v39  ;;  %v3459_v0 = vadd.f32 %v1390_v59, %v1389_v21  ;;  %v1271_v39 = vpop.f32.mrf.mxu1 }
 0x19c   : > { %v1310_v44 = vmul.f32 0.5, %v1297_v25  ;;  %v1328_v23 = vsel %vm422_vm0, %v1252_v26, 0.0  ;;  %v2233_v40 = vpop.eup %2232  ;;  %v1421_v7 = vsel %vm1419_vm2, %v1420_v6, %v1418_v60  ;;  %vm1424_vm5 = vcmp.eq.f32.partialorder %v3408_v3, inf }
 0x19d   : > { %v1481_v10 = vmul.f32 %v1465_v14, %v1465_v14  ;;  %v1482_v24 = vmul.f32 %v1466_v33, %v1466_v33  ;;  %v1330_v37 = vadd.f32 %v1329_v32, %v1328_v23  ;;  %1578 = vst.msk [vmem:[%s3287_s21 + $0x48] sm:$0xff] %vm422_vm0, %v1421_v7  ;;  %v1528_v42 = vmul.f32 %v2233_v40, %v3384_v12 }
 0x19e   : > { %vm1426_vm6 = vcmp.eq.f32.partialorder %v3408_v3, 0.0  ;;  %2238 = vrsqrt.f32 %v3459_v0  ;;  %1589 = vst.msk [vmem:[%s3287_s21 + $0xa0] sm:$0xff] %vm422_vm0, %v1310_v44  ;;  %v1355_v52 = vsub.f32 %v1059_v8, %v1310_v44  ;;  %v1074_v55 = vadd.f32 %v2051_v51, %v3250_v46 }
 0x19f   : > { %v1501_v49 = vsel %vm422_vm0, %v1481_v10, 0.0  ;;  %v1502_v22 = vsel %vm422_vm0, %v1482_v24, 0.0  ;;  %v1530_v62 = vsel %vm1529_vm3, %v3384_v12, %v1528_v42  ;;  %v1356_v61 = vsub.f32 %v3414_v38, %v1310_v44 }
 0x1a0   : > { %v3478_v27 = vadd.f32 %v1502_v22, %v1501_v49  ;;  %v1342_v54 = vmul.f32 0.5, %v1330_v37  ;;  %v1533_v50 = vsel %vm1531_vm4, %v1532_v36, %v1530_v62  ;;  %v1427_v45 = vand.u32 2147483648, %v3408_v3 }
 0x1a1   : > { %v2235_v2 = vpop.eup %2234  ;;  %vm1536_vm7 = vcmp.eq.f32.partialorder %v3433_v15, inf  ;;  %v1371_v20 = vmul.f32 %v1355_v52, %v1355_v52  ;;  %1580 = vst.msk [vmem:[%s3287_s21 + $0x58] sm:$0xff] %vm422_vm0, %v1533_v50  ;;  %vm1538_vm8 = vcmp.eq.f32.partialorder %v3433_v15, 0.0  ;;  %v1539_v58 = vand.u32 2147483648, %v3433_v15 }
 0x1a2   : > { %v1423_v57 = vmul.f32 %v2235_v2, %v3408_v3  ;;  %2240 = vrsqrt.f32 %v3478_v27  ;;  %1591 = vst.msk [vmem:[%s3287_s21 + $0xb0] sm:$0xff] %vm422_vm0, %v1342_v54  ;;  %vm1431_vm9 = vcmp.eq.f32.partialorder %v3459_v0, inf  ;;  %v1372_v12 = vmul.f32 %v1356_v61, %v1356_v61 }
 0x1a3   : > { %v1392_v13 = vsel %vm422_vm0, %v1371_v20, 0.0  ;;  %v1467_v34 = vsub.f32 %v1252_v26, %v1342_v54  ;;  %v3496_v38 = vadd.f32 %v2083_v63, %v3250_v46  ;;  %v1468_v43 = vsub.f32 %v3429_v16, %v1342_v54 }
 0x1a4   : > { %v1425_v35 = vsel %vm1424_vm5, %v3408_v3, %v1423_v57  ;;  %v1299_v41 = vsel %vm422_vm0, %v1074_v55, 0.0  ;;  %v1069_v30 = vadd.f32 %v3250_v46, %v1068_v5  ;;  %v1393_v53 = vsel %vm422_vm0, %v1372_v12, 0.0 }
 0x1a5   : > { %v2237_v17 = vpop.eup %2236  ;;  %v1428_v11 = vsel %vm1426_vm6, %v1427_v45, %v1425_v35  ;;  %v1483_v6 = vmul.f32 %v1467_v34, %v1467_v34  ;;  %v1262_v29 = vadd.f32 %v3250_v46, %v1261_v4  ;;  %v3511_v16 = vadd.f32 %v1393_v53, %v1392_v13 }
 0x1a6   : > { %1582 = vst.msk [vmem:[%s3287_s21 + $0x68] sm:$0xff] %vm422_vm0, %v1428_v11  ;;  %v1535_v48 = vmul.f32 %v2237_v17, %v3433_v15  ;;  %v1484_v8 = vmul.f32 %v1468_v43, %v1468_v43  ;;  %v1298_v31 = vsel %vm422_vm0, %v1069_v30, 0.0  ;;  %v1332_v3 = vsel %vm422_vm0, %v3496_v38, 0.0 }
 0x1a7   : > { %v1504_v36 = vsel %vm422_vm0, %v1483_v6, 0.0  ;;  %v1300_v56 = vadd.f32 %v1299_v41, %v1298_v31  ;;  %v1331_v18 = vsel %vm422_vm0, %v1262_v29, 0.0  ;;  %vm1433_vm10 = vcmp.eq.f32.partialorder %v3459_v0, 0.0 }
 0x1a8   : > { %v1537_v47 = vsel %vm1536_vm7, %v3433_v15, %v1535_v48  ;;  %v1434_v28 = vand.u32 2147483648, %v3459_v0  ;;  %2242 = vrsqrt.f32 %v3511_v16  ;;  %v1505_v25 = vsel %vm422_vm0, %v1484_v8, 0.0 }
 0x1a9   : > { %v1540_v32 = vsel %vm1538_vm8, %v1539_v58, %v1537_v47  ;;  %v1311_v26 = vmul.f32 0.5, %v1300_v56  ;;  %v1084_v21 = vadd.f32 %v2054_v9, %v3250_v46  ;;  %vm1543_vm11 = vcmp.eq.f32.partialorder %v3478_v27, inf }
 0x1aa   : > { %1584 = vst.msk [vmem:[%s3287_s21 + $0x78] sm:$0xff] %vm422_vm0, %v1540_v32  ;;  %v3531_v59 = vadd.f32 %v1505_v25, %v1504_v36  ;;  %v1333_v14 = vadd.f32 %v1332_v3, %v1331_v18  ;;  %v1277_v33 = vadd.f32 %v2086_v19, %v3250_v46  ;;  %v1079_v15 = vadd.f32 %v3250_v46, %v1078_v1 }
 0x1ab   : > { %v2239_v60 = vpop.eup %2238  ;;  %v1357_v44 = vsub.f32 %v1069_v30, %v1311_v26  ;;  %v1358_v23 = vsub.f32 %v1074_v55, %v1311_v26  ;;  %1593 = vst.msk [vmem:[%s3287_s21 + $0xc0] sm:$0xff] %vm422_vm0, %v1311_v26  ;;  %v1272_v51 = vadd.f32 %v3250_v46, %v1271_v39  ;;  %vm1545_vm12 = vcmp.eq.f32.partialorder %v3478_v27, 0.0 }
 0x1ac   : > { %v1430_v63 = vmul.f32 %v2239_v60, %v3459_v0  ;;  %v1546_v40 = vand.u32 2147483648, %v3478_v27  ;;  %2244 = vrsqrt.f32 %v3531_v59  ;;  %v1343_v24 = vmul.f32 0.5, %v1333_v14 }
 0x1ad   : > { %v1373_v7 = vmul.f32 %v1357_v44, %v1357_v44  ;;  %v1374_v10 = vmul.f32 %v1358_v23, %v1358_v23  ;;  %v1302_v37 = vsel %vm422_vm0, %v1084_v21, 0.0  ;;  %v1335_v46 = vsel %vm422_vm0, %v1277_v33, 0.0 }
 0x1ae   : > { %v1432_v42 = vsel %vm1431_vm9, %v3459_v0, %v1430_v63  ;;  %v1301_v49 = vsel %vm422_vm0, %v1079_v15, 0.0  ;;  %v1334_v22 = vsel %vm422_vm0, %v1272_v51, 0.0  ;;  %v1469_v54 = vsub.f32 %v1262_v29, %v1343_v24  ;;  %1595 = vst.msk [vmem:[%s3287_s21 + $0xd0] sm:$0xff] %vm422_vm0, %v1343_v24 }
 0x1af   : > { %v2241_v52 = vpop.eup %2240  ;;  %v1435_v55 = vsel %vm1433_vm10, %v1434_v28, %v1432_v42  ;;  %v1395_v62 = vsel %vm422_vm0, %v1373_v7, 0.0  ;;  %v1396_v61 = vsel %vm422_vm0, %v1374_v10, 0.0  ;;  %v1470_v2 = vsub.f32 %v3496_v38, %v1343_v24 }
 0x1b0   : > { %1586 = vst.msk [vmem:[%s3287_s21 + $0x88] sm:$0xff] %vm422_vm0, %v1435_v55  ;;  %v1542_v5 = vmul.f32 %v2241_v52, %v3478_v27  ;;  %v1397_v4 = vadd.f32 %v1396_v61, %v1395_v62  ;;  %v1303_v50 = vadd.f32 %v1302_v37, %v1301_v49  ;;  %v1485_v45 = vmul.f32 %v1469_v54, %v1469_v54 }
 0x1b1   : > { %v1336_v20 = vadd.f32 %v1335_v46, %v1334_v22  ;;  %v1486_v58 = vmul.f32 %v1470_v2, %v1470_v2  ;;  %vm1438_vm13 = vcmp.eq.f32.partialorder %v3511_v16, inf  ;;  %vm1440_vm14 = vcmp.eq.f32.partialorder %v3511_v16, 0.0 }
 0x1b2   : > { %v1544_v0 = vsel %vm1543_vm11, %v3478_v27, %v1542_v5  ;;  %2246 = vrsqrt.f32 %v1397_v4  ;;  %v1507_v12 = vsel %vm422_vm0, %v1485_v45, 0.0  ;;  %v1312_v13 = vmul.f32 0.5, %v1303_v50 }
 0x1b3   : > { %v1547_v57 = vsel %vm1545_vm12, %v1546_v40, %v1544_v0  ;;  %v1344_v34 = vmul.f32 0.5, %v1336_v20  ;;  %v1441_v35 = vand.u32 2147483648, %v3511_v16  ;;  %v1508_v43 = vsel %vm422_vm0, %v1486_v58, 0.0 }
 0x1b4   : > { %1588 = vst.msk [vmem:[%s3287_s21 + $0x98] sm:$0xff] %vm422_vm0, %v1547_v57  ;;  %v1509_v41 = vadd.f32 %v1508_v43, %v1507_v12  ;;  %v1359_v30 = vsub.f32 %v1079_v15, %v1312_v13  ;;  %v1360_v9 = vsub.f32 %v1084_v21, %v1312_v13  ;;  %1597 = vst.msk [vmem:[%s3287_s21 + $0xe0] sm:$0xff] %vm422_vm0, %v1312_v13  ;;  %vm1550_vm15 = vcmp.eq.f32.partialorder %v3531_v59, inf }
 0x1b5   : > { %v2243_v38 = vpop.eup %2242  ;;  %1599 = vst.msk [vmem:[%s3287_s21 + $0xf0] sm:$0xff] %vm422_vm0, %v1344_v34  ;;  %v1471_v19 = vsub.f32 %v1272_v51, %v1344_v34  ;;  %v1472_v17 = vsub.f32 %v1277_v33, %v1344_v34  ;;  %v1553_v29 = vand.u32 2147483648, %v3531_v59  ;;  %vm1552_vm1 = vcmp.eq.f32.partialorder %v3531_v59, 0.0 }
 0x1b6   : > { %v1437_v27 = vmul.f32 %v2243_v38, %v3511_v16  ;;  %2248 = vrsqrt.f32 %v1509_v41  ;;  %v1375_v48 = vmul.f32 %v1359_v30, %v1359_v30  ;;  %v1376_v8 = vmul.f32 %v1360_v9, %v1360_v9 }
 0x1b7   : > { %v1487_v36 = vmul.f32 %v1471_v19, %v1471_v19  ;;  %v1488_v3 = vmul.f32 %v1472_v17, %v1472_v17  ;;  %vm1445_vm2 = vcmp.eq.f32.partialorder %v1397_v4, inf  ;;  %v1448_v26 = vand.u32 2147483648, %v1397_v4 }
 0x1b8   : > { %v1439_v11 = vsel %vm1438_vm13, %v3511_v16, %v1437_v27  ;;  %v1398_v16 = vsel %vm422_vm0, %v1375_v48, 0.0  ;;  %v1399_v56 = vsel %vm422_vm0, %v1376_v8, 0.0  ;;  %vm1447_vm3 = vcmp.eq.f32.partialorder %v1397_v4, 0.0 }
 0x1b9   : > { %v2245_v53 = vpop.eup %2244  ;;  %v1442_v6 = vsel %vm1440_vm14, %v1441_v35, %v1439_v11  ;;  %v1400_v47 = vadd.f32 %v1399_v56, %v1398_v16  ;;  %v1510_v28 = vsel %vm422_vm0, %v1487_v36, 0.0  ;;  %v1511_v1 = vsel %vm422_vm0, %v1488_v3, 0.0 }
 0x1ba   : > { %1590 = vst.msk [vmem:[%s3287_s21 + $0xa8] sm:$0xff] %vm422_vm0, %v1442_v6  ;;  %v1549_v31 = vmul.f32 %v2245_v53, %v3531_v59  ;;  %v1512_v32 = vadd.f32 %v1511_v1, %v1510_v28  ;;  %vm1557_vm4 = vcmp.eq.f32.partialorder %v1509_v41, inf  ;;  %v1560_v60 = vand.u32 2147483648, %v1509_v41 }
 0x1bb   : > { %2250 = vrsqrt.f32 %v1400_v47  ;;  %vm1559_vm5 = vcmp.eq.f32.partialorder %v1509_v41, 0.0  ;;  %vm1452_vm6 = vcmp.eq.f32.partialorder %v1400_v47, inf  ;;  %v1455_v63 = vand.u32 2147483648, %v1400_v47 }
 0x1bc   : > { %v1551_v18 = vsel %vm1550_vm15, %v3531_v59, %v1549_v31  ;;  %2252 = vrsqrt.f32 %v1512_v32  ;;  %vm1454_vm7 = vcmp.eq.f32.partialorder %v1400_v47, 0.0  ;;  %vm1564_vm8 = vcmp.eq.f32.partialorder %v1512_v32, inf }
 0x1bd   : > { %v1554_v39 = vsel %vm1552_vm1, %v1553_v29, %v1551_v18  ;;  %v1567_v10 = vand.u32 2147483648, %v1512_v32  ;;  %vm1566_vm9 = vcmp.eq.f32.partialorder %v1512_v32, 0.0 }
 0x1be   : > { %1592 = vst.msk [vmem:[%s3287_s21 + $0xb8] sm:$0xff] %vm422_vm0, %v1554_v39 }
 0x1bf   : > { %v2247_v25 = vpop.eup %2246 }
 0x1c0   : > { %v1444_v21 = vmul.f32 %v2247_v25, %v1397_v4 }
 0x1c2   : > { %v1446_v59 = vsel %vm1445_vm2, %v1397_v4, %v1444_v21 }
 0x1c3   : > { %v1449_v14 = vsel %vm1447_vm3, %v1448_v26, %v1446_v59  ;;  %v2249_v33 = vpop.eup %2248 }
 0x1c4   : > { %1594 = vst.msk [vmem:[%s3287_s21 + $0xc8] sm:$0xff] %vm422_vm0, %v1449_v14  ;;  %v1556_v44 = vmul.f32 %v2249_v33, %v1509_v41 }
 0x1c6   : > { %v1558_v23 = vsel %vm1557_vm4, %v1509_v41, %v1556_v44 }
 0x1c7   : > { %v1561_v15 = vsel %vm1559_vm5, %v1560_v60, %v1558_v23 }
 0x1c8   : > { %1596 = vst.msk [vmem:[%s3287_s21 + $0xd8] sm:$0xff] %vm422_vm0, %v1561_v15  ;;  %v2251_v51 = vpop.eup %2250 }
 0x1c9   : > { %v2253_v40 = vpop.eup %2252  ;;  %v1451_v7 = vmul.f32 %v2251_v51, %v1400_v47 }
 0x1ca   : > { %v1563_v24 = vmul.f32 %v2253_v40, %v1512_v32 }
 0x1cb   : > { %v1453_v37 = vsel %vm1452_vm6, %v1400_v47, %v1451_v7 }
 0x1cc   : > { %v1456_v42 = vsel %vm1454_vm7, %v1455_v63, %v1453_v37  ;;  %v1565_v46 = vsel %vm1564_vm8, %v1512_v32, %v1563_v24 }
 0x1cd   : > { %1598 = vst.msk [vmem:[%s3287_s21 + $0xe8] sm:$0xff] %vm422_vm0, %v1456_v42  ;;  %v1568_v49 = vsel %vm1566_vm9, %v1567_v10, %v1565_v46 }
 0x1ce   : > { %1600 = vst.msk [vmem:[%s3287_s21 + $0xf8] sm:$0xff] %vm422_vm0, %v1568_v49 }
 0x1cf   : > { %2349 = shalt.err (!%p2346_p10)
}
 0x1d0   : > { %s2350_s18 = scalar_lea.hbm %s3599_s29, 4096  ;;  %s2354_s9 = scalar_lea.hbm %s3679_s6, 8192 }
 0x1d1   : > { %p2351_p1 = scmp.ne.s32.totalorder %s3599_s29, %s2350_s18  ;;  %p2355_p7 = scmp.lt.s32.totalorder %s3599_s29, %s3679_s6 }
 0x1d2   : > { %p2356_p8 = scmp.lt.s32.totalorder %s2354_s9, %s2350_s18 }
 0x1d3   : > { %p2352_p4 = pnand %p2351_p1, %p3712_p9 }
 0x1d4   : > { %p2357_p11 = por %p2356_p8, %p2355_p7 }
 0x1d5   : > { %p2353_p3 = pneg %p2352_p4 }
 0x1d7   : > { %p2358_p6 = pnand %p2357_p11, %p2353_p3 }
 0x1d9   : > { %2361 = shalt.err (!%p2358_p6)
}
 0x1da   : > { %s2446_s26 = smov 128   ;;  %s2447_s13 = smov 8   ;;  %v1641_v22 = vlaneseq  ;;  %v404_v62 = vld [vmem:[%s3677_s4] sm:$0xf] }
 0x1db   : > { %2095 = dma.vmem_to_hbm [thread:$0]  (%p3712_p9), %s3601_s17, 4096, %s3599_s29, %s1748_s10, %s2446_s26, %s2446_s26, %s2447_s13  }
 0x1dc   : > { %v1642_v52 = vshrl.u32 %v1641_v22, 7  ;;  %v1968_v0 = vld [vmem:[%s3678_s5] ss:$0 sm:$0xff]  ;;  %s1934_s17 = sshll.u32 %s2654_s0, 3  ;;  %s1974_s29 = sshll.u32 %s2510_s28, 7 }
 0x1dd   : > { %s363_s10 = scalar_lea.vmem [#allocation9], %s1934_s17  ;;  %s1781_s8 = scalar_lea.hbm %s3680_s7, %s1974_s29 }
 0x1de   : > { %v1643_v55 = vsub.s32 0, %v1642_v52  ;;  %v1676_v61 = vsub.s32 1, %v1642_v52  ;;  %v1709_v2 = vsub.s32 2, %v1642_v52  ;;  %v1742_v20 = vsub.s32 3, %v1642_v52  ;;  %s1783_s11 = sshll.u32 %s363_s10, 4  ;;  %s1753_s18 = scalar_lea.sflag [#allocation10], %s2654_s0  ;;  %s1784_s11 = int_to_ptr.vmem [resolvable:$true] %s1783_s11 }
 0x1df   : > { %s2362_s20 = scalar_lea.vmem %s1784_s11, 128  ;;  %s2448_s19 = smov [#allocation9]  }
 0x1e0   : > { %v1644_v54 = vrot.slane %v404_v62, %v1643_v55  ;;  %v1677_v4 = vrot.slane %v404_v62, %v1676_v61  ;;  %v1710_v58 = vrot.slane %v404_v62, %v1709_v2  ;;  %v1743_v13 = vrot.slane %v404_v62, %v1742_v20  ;;  %p2363_p12 = scmp.ne.s32.totalorder %s1784_s11, %s2362_s20  ;;  %s2366_s28 = sshll.u32 %s2448_s19, 4  ;;  %s2367_s28 = int_to_ptr.vmem [resolvable:$false] %s2366_s28 }
 0x1e1   : > { %s2368_s9 = scalar_lea.vmem %s2367_s28, 256  ;;  %p2369_p5 = scmp.lt.s32.totalorder %s1784_s11, %s2367_s28 }
 0x1e2   : > { %p2364_p13 = pnand %p2363_p12, %p3712_p9  ;;  %p2370_p2 = scmp.lt.s32.totalorder %s2368_s9, %s2362_s20 }
 0x1e3   : > { %v1640_v5 = vpop.xlane.xlu0 %1639 }
 0x1e4   : > { %v1645_v45 = vmul.f32 %v1644_v54, %v1640_v5  ;;  %p2365_p0 = pneg %p2364_p13  ;;  %p2371_p10 = por %p2370_p2, %p2369_p5 }
 0x1e6   : > { %v1646_v12 = vadd.f32 %v1968_v0, %v1645_v45  ;;  %p2372_p1 = pnand %p2371_p10, %p2365_p0 }
 0x1ef   : > { %v1673_v50 = vpop.xlane.xlu1 %1672 }
 0x1f0   : > { %v1678_v57 = vmul.f32 %v1677_v4, %v1673_v50 }
 0x1f2   : > { %v1679_v35 = vadd.f32 %v1678_v57, %v1646_v12 }
 0x1fe   : > { %v1739_v34 = vpop.xlane.xlu1 %1738  ;;  %v1706_v38 = vpop.xlane.xlu0 %1705 }
 0x1ff   : > { %v1711_v43 = vmul.f32 %v1710_v58, %v1706_v38  ;;  %v1744_v27 = vmul.f32 %v1743_v13, %v1739_v34 }
 0x201   : > { %v1712_v41 = vadd.f32 %v1711_v43, %v1679_v35 }
 0x203   : > { %v1745_v30 = vadd.f32 %v1744_v27, %v1712_v41 }
 0x205   : > { %1746 = vst.msk [vmem:[%s363_s10] sm:$0xff] %vm422_vm0, %v1745_v30 }
 0x206   : > { %2375 = shalt.err (!%p2372_p1)
}
 0x207   : > { %s2376_s12 = scalar_lea.hbm %s1781_s8, 128  ;;  %s2380_s26 = scalar_lea.hbm %s3680_s7, 256 }
 0x208   : > { %p2377_p4 = scmp.ne.s32.totalorder %s1781_s8, %s2376_s12  ;;  %p2381_p8 = scmp.lt.s32.totalorder %s1781_s8, %s3680_s7 }
 0x209   : > { %p2382_p11 = scmp.lt.s32.totalorder %s2380_s26, %s2376_s12 }
 0x20a   : > { %p2378_p3 = pnand %p2377_p4, %p3712_p9 }
 0x20b   : > { %p2383_p6 = por %p2382_p11, %p2381_p8 }
 0x20c   : > { %p2379_p7 = pneg %p2378_p3 }
 0x20e   : > { %p2384_p12 = pnand %p2383_p6, %p2379_p7 }
 0x210   : > { %2387 = shalt.err (!%p2384_p12)
}
 0x211   : > { %2096 = dma.vmem_to_hbm [thread:$0]  (%p3712_p9), %s1784_s11, 128, %s1781_s8, %s1753_s18  }
 0x212 PF: > { %s3713_s14 = sld [smem:[#allocation17_spill]]  ;;  %s1795_s2 = sand.u32 1, %s2426_s24  }
 0x213   : > { %p3715_p0 = scmp.ge.s32.totalorder %s2438_s27, 2  ;;  %s1796_s23 = scalar_lea.sflag [#allocation4], %s1795_s2 }
 0x218   : > { %p3714_p13 = scmp.ne.s32.totalorder %s3713_s14, 0 }
 0x21a   : > { %p2111_p5 = pnand %p3715_p0, %p3714_p13 }
 0x21c   : > { %p2112_p2 = pneg %p2111_p5 }
 0x21e   : > { %2417 = dma.done.wait (%p2112_p2), %s1796_s23, 4096  }
 0x21f   : > { %2419 = vsyncadd (%p2112_p2), %s1796_s23, 4294963200  ;;  %s1805_s17 = scalar_lea.sflag [#allocation10], %s1795_s2 }
 0x220   : > { %2421 = dma.done.wait (%p2112_p2), %s1805_s17, 128  }
 0x221   : > { %2423 = vsyncadd (%p2112_p2), %s1805_s17, 4294967168  ;;  %s3716_s27 = sld [smem:[#allocation18_spill]]  ;;  %s3719_s24 = smov %s2430_s25 }
 0x222   : > { %s3717_s29 = sld [smem:[#allocation16_spill]] }
 0x223   : > { %s3718_s26 = sld [smem:[#allocation19_spill]] }
 0x227   : > { %p27_p9 = scmp.ge.s32.totalorder %s3716_s27, 4  }
 0x228   : > { %s3720_s25 = smov %s3717_s29 }
 0x229   :  { %29 = sbr.rel (!%p27_p9) target bundleno = 12 (0xc), region = 123 }
 0x22e   :  { %1810 = vsyncpa [#allocation3], 1 }
 0x22f   :  { %1812 = vsyncpa [#allocation3 + $0x1], 1 }
 0x230   :  { %1813 = vsyncpa [#allocation6], 1 }
 0x231   :  { %1815 = vsyncpa [#allocation6 + $0x1], 1 }
 0x232   :  { %1816 = vsyncpa [#allocation4], 1 }
 0x233   :  { %1818 = vsyncpa [#allocation4 + $0x1], 1 }
 0x234   :  { %1819 = vsyncpa [#allocation10], 1 }
 0x235   :  { %1821 = vsyncpa [#allocation10 + $0x1], 1 }

</bundles_post_ra>
